<compile_context>
chip_gen: v7x
topology: tpu7x:2x2x1
jax: 0.10.0
libtpu: 0.0.40
codegen_flags: <defaults>
</compile_context>

<pallas_src>
import numpy as np
import jax
import jax.numpy as jnp
from jax.experimental import pallas as pl
from jax.experimental.pallas import tpu as pltpu


def _round_up(n, m):
    return ((n + m - 1) // m) * m


# ---------------------------------------------------------------------------
# Fused RDB kernel
# ---------------------------------------------------------------------------
def make_rdb_kernel(cin, growth, num_layers, L, margin, Wp):
    """feat scratch: (ctot, margin + L + margin) bf16, zero margins.
    taps scratch: (9*(ctot-growth), L) bf16, row = 9*group_start + t*gsize + c
    (t = ky*3 + kx), i.e. an incrementally-built im2row buffer whose leading
    9*c0 rows are exactly layer li's matmul LHS."""
    ctot = cin + growth * num_layers
    offs = [(dy - 1) * Wp + (dx - 1) for dy in range(3) for dx in range(3)]

    def kernel(*args):
        x_ref = args[0]                         # (1, cin, L)            f32
        mask_ref = args[1]                      # (1, L)                 f32
        dense_refs = args[2:2 + 2 * num_layers]
        wl_ref = args[2 + 2 * num_layers]       # (growth, ctot)         bf16
        bl_ref = args[3 + 2 * num_layers]       # (growth, 1)            f32
        o_ref = args[4 + 2 * num_layers]        # (1, growth, L)         f32
        feat = args[5 + 2 * num_layers]         # (ctot, 2*margin+L)     bf16 scratch
        taps = args[6 + 2 * num_layers]         # (9*(ctot-growth), L)   bf16 scratch

        # Keep the (never-written) margin bands zero so every lane-shifted tap
        # window reads zeros outside the frame group.  The interior columns
        # are fully overwritten each step, so they need no zeroing at all.
        zeros_m = jnp.zeros((ctot, margin), feat.dtype)
        feat[:, 0:margin] = zeros_m
        feat[:, margin + L:2 * margin + L] = zeros_m

        def shift_into_taps(c_start, c_size, row_base):
            # im2row: store the 9 lane-shifted windows of the c_size channels
            # just written to `feat` as contiguous rows of `taps`.  Only the
            # NEW channels are shifted each layer (review item #5).
            for t, off in enumerate(offs):
                taps[row_base + t * c_size:row_base + (t + 1) * c_size, :] = (
                    feat[c_start:c_start + c_size,
                         margin + off:margin + off + L])

        # Input channels (wrapper already zero-padded border + tail).
        feat[0:cin, margin:margin + L] = x_ref[0].astype(jnp.bfloat16)
        shift_into_taps(0, cin, 0)

        interior = mask_ref[...]                # 1.0 inside the HxW image

        c0 = cin
        for li in range(num_layers):
            w_ref = dense_refs[2 * li]          # (growth, 9*c0)  bf16
            b_ref = dense_refs[2 * li + 1]      # (growth, 1)     f32
            # One MXU matmul per layer with K = 9*c0 (review item #1).
            acc = jnp.dot(w_ref[...], taps[0:9 * c0, :],
                          preferred_element_type=jnp.float32)
            acc = jnp.maximum(acc + b_ref[...], 0.0) * interior   # f32 math
            feat[c0:c0 + growth, margin:margin + L] = acc.astype(jnp.bfloat16)
            if li + 1 < num_layers:             # last layer feeds only the LFF
                shift_into_taps(c0, growth, 9 * c0)
            c0 += growth

        # Local feature fusion (1x1 conv over all ctot channels) + residual.
        y = jnp.dot(wl_ref[...], feat[0:ctot, margin:margin + L],
                    preferred_element_type=jnp.float32)
        y = y + bl_ref[...] + x_ref[0]          # residual from the f32 input
        o_ref[0] = y.astype(o_ref.dtype)

    return kernel


# ---------------------------------------------------------------------------
# Wrapper (pallas_call plumbing)
# ---------------------------------------------------------------------------
def rdb_forward(x, params, batch_per_step=None):
    """x: (B, C, H, W) NCHW float32.  Returns x + lff(dense_layers(x))."""
    B, C, H, W = x.shape
    growth = params["dense"][0][0].shape[-1]
    num_layers = len(params["dense"])
    ctot = C + growth * num_layers
    assert C == growth, "RDB residual add requires in_channels == growth_rate"

    Hp, Wp = H + 2, W + 2
    npix = Hp * Wp
    n_flat = _round_up(npix, 128)               # lane-dense flattened frame
    margin = _round_up(Wp + 1, 128)             # covers the +-(Wp+1) conv taps

    # Fold batch frames onto the lane axis (review item #4) but keep >= 2
    # grid steps so a megacore chip can use both TensorCores.
    if batch_per_step is None:
        batch_per_step = B // 2 if (B % 2 == 0 and B >= 2) else 1
    while B % batch_per_step:
        batch_per_step -= 1
    G = B // batch_per_step
    L = batch_per_step * n_flat

    # Zero-pad spatially ONCE, flatten frames, fold batch groups onto lanes.
    xp = jnp.pad(x, ((0, 0), (0, 0), (1, 1), (1, 1))).reshape(B, C, npix)
    xp = jnp.pad(xp, ((0, 0), (0, 0), (0, n_flat - npix)))
    xp = xp.reshape(G, batch_per_step, C, n_flat).transpose(0, 2, 1, 3)
    xp = xp.reshape(G, C, L)

    # Interior mask for one flattened padded frame, tiled over folded frames.
    # Cross-frame taps only ever read masked-to-zero positions, so frames in
    # one group cannot leak into each other.
    pix = np.arange(n_flat)
    row, col = pix // Wp, pix % Wp
    interior = (row >= 1) & (row <= H) & (col >= 1) & (col <= W)
    mask = jnp.asarray(np.tile(interior.astype(np.float32),
                               batch_per_step)[None, :])

    def pack_dense_weight(w):
        # HWIO (3,3,c0,growth) -> (growth, 9*c0), K ordered
        # [group][tap t=ky*3+kx][channel-within-group] to match `taps` rows.
        c0 = w.shape[2]
        pieces, start = [], 0
        for gsize in [C] + [growth] * ((c0 - C) // growth):
            wg = jnp.transpose(w[:, :, start:start + gsize, :], (3, 0, 1, 2))
            pieces.append(wg.reshape(growth, 9 * gsize))
            start += gsize
        return jnp.concatenate(pieces, axis=1).astype(jnp.bfloat16)

    args = [xp, mask]
    in_specs = [
        pl.BlockSpec((1, C, L), lambda g: (g, 0, 0)),
        pl.BlockSpec((1, L), lambda g: (0, 0)),
    ]
    for li, (w, bvec) in enumerate(params["dense"]):
        c0 = C + growth * li
        args += [pack_dense_weight(w), bvec.reshape(growth, 1)]
        in_specs += [
            pl.BlockSpec((growth, 9 * c0), lambda g: (0, 0)),
            pl.BlockSpec((growth, 1), lambda g: (0, 0)),
        ]
    args += [params["lff_w"].T.astype(jnp.bfloat16),
             params["lff_b"].reshape(growth, 1)]
    in_specs += [
        pl.BlockSpec((growth, ctot), lambda g: (0, 0)),
        pl.BlockSpec((growth, 1), lambda g: (0, 0)),
    ]

    kernel = make_rdb_kernel(C, growth, num_layers, L, margin, Wp)
    out_flat = pl.pallas_call(
        kernel,
        out_shape=jax.ShapeDtypeStruct((G, growth, L), x.dtype),
        grid_spec=pltpu.PrefetchScalarGridSpec(
            num_scalar_prefetch=0,
            grid=(G,),
            in_specs=in_specs,
            out_specs=pl.BlockSpec((1, growth, L), lambda g: (g, 0, 0)),
            scratch_shapes=[
                pltpu.VMEM((ctot, 2 * margin + L), jnp.bfloat16),    # feat
                pltpu.VMEM((9 * (ctot - growth), L), jnp.bfloat16),  # taps (im2row)
            ],
        ),
        compiler_params=pltpu.CompilerParams(
            dimension_semantics=("parallel",),
            vmem_limit_bytes=32 * 1024 * 1024),
    )(*args)

    # Unfold batch and strip the zero border / tail back to (B, growth, H, W).
    out = (out_flat.reshape(G, growth, batch_per_step, n_flat)
           .transpose(0, 2, 1, 3).reshape(B, growth, n_flat))
    out = out[:, :, :npix].reshape(B, growth, Hp, Wp)[:, :, 1:H + 1, 1:W + 1]
    return out


# ---------------------------------------------------------------------------
# Parameters + pure-JAX reference (for validation)
# ---------------------------------------------------------------------------
def init_rdb_params(key, in_channels, growth_rate, num_layers):
    params = {"dense": [], "lff_w": None, "lff_b": None}
    for i in range(num_layers):
        cin = in_channels + growth_rate * i
        key, kw, kb = jax.random.split(key, 3)
        w = jax.random.normal(kw, (3, 3, cin, growth_rate), jnp.float32) / jnp.sqrt(9.0 * cin)
        b = 0.1 * jax.random.normal(kb, (growth_rate,), jnp.float32)
        params["dense"].append((w, b))
    ctot = in_channels + growth_rate * num_layers
    key, kw, kb = jax.random.split(key, 3)
    params["lff_w"] = jax.random.normal(kw, (ctot, growth_rate), jnp.float32) / jnp.sqrt(float(ctot))
    params["lff_b"] = 0.1 * jax.random.normal(kb, (growth_rate,), jnp.float32)
    return params


def rdb_reference(x, params, emulate_bf16=False):
    """NCHW reference.  emulate_bf16=True rounds conv operands to bf16 to
    mirror the kernel's (bf16 operands, f32 accumulate) precision."""
    dn = ("NCHW", "HWIO", "NCHW")
    prec = jax.lax.Precision.HIGHEST

    def rnd(a):
        return a.astype(jnp.bfloat16).astype(jnp.float32) if emulate_bf16 else a

    feat = x
    for (w, b) in params["dense"]:
        y = jax.lax.conv_general_dilated(rnd(feat), rnd(w), (1, 1), "SAME",
                                         dimension_numbers=dn, precision=prec)
        y = jnp.maximum(y + b.reshape(1, -1, 1, 1), 0.0)
        feat = jnp.concatenate([feat, y], axis=1)
    w1 = params["lff_w"].reshape(1, 1, *params["lff_w"].shape)
    y = jax.lax.conv_general_dilated(rnd(feat), rnd(w1), (1, 1), "SAME",
                                     dimension_numbers=dn, precision=prec)
    y = y + params["lff_b"].reshape(1, -1, 1, 1)
    return x + y


# ---------------------------------------------------------------------------
if __name__ == "__main__":
    B, H, W = 4, 16, 16
    in_channels = growth_rate = 16     # residual add requires equality (as in torch)
    num_layers = 3

    key = jax.random.PRNGKey(0)
    key, kx = jax.random.split(key)
    x = jax.random.normal(kx, (B, in_channels, H, W), jnp.float32)   # NCHW, like torch
    params = init_rdb_params(key, in_channels, growth_rate, num_layers)

    out = jax.block_until_ready(rdb_forward(x, params))

    # Tight check vs a reference matching the kernel's bf16-operand precision,
    # loose check vs the pure-f32 reference.
    ref_bf16 = jax.block_until_ready(rdb_reference(x, params, emulate_bf16=True))
    ref_f32 = jax.block_until_ready(rdb_reference(x, params, emulate_bf16=False))

    assert out.shape == (B, in_channels, H, W)
    err_tight = float(jnp.max(jnp.abs(out - ref_bf16)))
    err_loose = float(jnp.max(jnp.abs(out - ref_f32)))
    assert err_tight < 3e-2, f"mismatch vs bf16-emulating reference: {err_tight}"
    assert err_loose < 1.5e-1, f"mismatch vs f32 reference: {err_loose}"

    print("KERNEL_OK")
</pallas_src>

<mosaic_0001>
module attributes {stable_mosaic.version = 11 : i64} {
  func.func @kernel(%arg0: i32, %arg1: memref<1x16x768xf32, #tpu.memory_space<vmem>>, %arg2: memref<1x768xf32, #tpu.memory_space<vmem>>, %arg3: memref<16x144xbf16, #tpu.memory_space<vmem>>, %arg4: memref<16x1xf32, #tpu.memory_space<vmem>>, %arg5: memref<16x288xbf16, #tpu.memory_space<vmem>>, %arg6: memref<16x1xf32, #tpu.memory_space<vmem>>, %arg7: memref<16x432xbf16, #tpu.memory_space<vmem>>, %arg8: memref<16x1xf32, #tpu.memory_space<vmem>>, %arg9: memref<16x64xbf16, #tpu.memory_space<vmem>>, %arg10: memref<16x1xf32, #tpu.memory_space<vmem>>, %arg11: memref<1x16x768xf32, #tpu.memory_space<vmem>>, %arg12: memref<64x1024xbf16, #tpu.memory_space<vmem>>, %arg13: memref<432x768xbf16, #tpu.memory_space<vmem>>) attributes {dimension_semantics = [#tpu.dimension_semantics<parallel>], iteration_bounds = array<i64: 2>, scalar_prefetch = 0 : i64, scratch_operands = 2 : i64, tpu.core_type = #tpu.core_type<tc>, window_params = [{transform_indices = @transform_0, window_bounds = array<i64: 1, 16, 768>}, {pipeline_mode = #tpu.pipeline_mode<synchronous>, transform_indices = @transform_1, window_bounds = array<i64: 1, 768>}, {pipeline_mode = #tpu.pipeline_mode<synchronous>, transform_indices = @transform_2, window_bounds = array<i64: 16, 144>}, {pipeline_mode = #tpu.pipeline_mode<synchronous>, transform_indices = @transform_3, window_bounds = array<i64: 16, 1>}, {pipeline_mode = #tpu.pipeline_mode<synchronous>, transform_indices = @transform_4, window_bounds = array<i64: 16, 288>}, {pipeline_mode = #tpu.pipeline_mode<synchronous>, transform_indices = @transform_5, window_bounds = array<i64: 16, 1>}, {pipeline_mode = #tpu.pipeline_mode<synchronous>, transform_indices = @transform_6, window_bounds = array<i64: 16, 432>}, {pipeline_mode = #tpu.pipeline_mode<synchronous>, transform_indices = @transform_7, window_bounds = array<i64: 16, 1>}, {pipeline_mode = #tpu.pipeline_mode<synchronous>, transform_indices = @transform_8, window_bounds = array<i64: 16, 64>}, {pipeline_mode = #tpu.pipeline_mode<synchronous>, transform_indices = @transform_9, window_bounds = array<i64: 16, 1>}, {transform_indices = @transform_10, window_bounds = array<i64: 1, 16, 768>}]} {
    %cst = arith.constant 0.000000e+00 : bf16
    %0 = vector.broadcast %cst : bf16 to vector<64x128xbf16>
    %c0 = arith.constant 0 : index
    %c0_0 = arith.constant 0 : index
    %1 = vector.load %arg12[%c0, %c0_0] : memref<64x1024xbf16, #tpu.memory_space<vmem>>, vector<64x128xbf16>
    tpu.vector_store %arg12[%c0, %c0_0], %0 {strides = array<i32>} : memref<64x1024xbf16, #tpu.memory_space<vmem>>, vector<64x128xbf16>,
    %c0_1 = arith.constant 0 : index
    %c896 = arith.constant 896 : index
    %2 = vector.load %arg12[%c0_1, %c896] : memref<64x1024xbf16, #tpu.memory_space<vmem>>, vector<64x128xbf16>
    tpu.vector_store %arg12[%c0_1, %c896], %0 {strides = array<i32>} : memref<64x1024xbf16, #tpu.memory_space<vmem>>, vector<64x128xbf16>,
    %c0_2 = arith.constant 0 : index
    %c0_3 = arith.constant 0 : index
    %c0_4 = arith.constant 0 : index
    %3 = vector.load %arg1[%c0_2, %c0_3, %c0_4] : memref<1x16x768xf32, #tpu.memory_space<vmem>>, vector<1x16x768xf32>
    %4 = vector.shape_cast %3 : vector<1x16x768xf32> to vector<16x768xf32>
    %5 = arith.truncf %4 : vector<16x768xf32> to vector<16x768xbf16>
    %c0_5 = arith.constant 0 : index
    %c128 = arith.constant 128 : index
    %6 = vector.load %arg12[%c0_5, %c128] : memref<64x1024xbf16, #tpu.memory_space<vmem>>, vector<16x768xbf16>
    tpu.vector_store %arg12[%c0_5, %c128], %5 {strides = array<i32>} : memref<64x1024xbf16, #tpu.memory_space<vmem>>, vector<16x768xbf16>,
    %c0_6 = arith.constant 0 : index
    %c109 = arith.constant 109 : index
    %7 = vector.load %arg12[%c0_6, %c109] : memref<64x1024xbf16, #tpu.memory_space<vmem>>, vector<16x768xbf16>
    %c0_7 = arith.constant 0 : index
    %c0_8 = arith.constant 0 : index
    %8 = vector.load %arg13[%c0_7, %c0_8] : memref<432x768xbf16, #tpu.memory_space<vmem>>, vector<16x768xbf16>
    tpu.vector_store %arg13[%c0_7, %c0_8], %7 {strides = array<i32>} : memref<432x768xbf16, #tpu.memory_space<vmem>>, vector<16x768xbf16>,
    %c0_9 = arith.constant 0 : index
    %c110 = arith.constant 110 : index
    %9 = vector.load %arg12[%c0_9, %c110] : memref<64x1024xbf16, #tpu.memory_space<vmem>>, vector<16x768xbf16>
    %c16 = arith.constant 16 : index
    %c0_10 = arith.constant 0 : index
    %10 = vector.load %arg13[%c16, %c0_10] : memref<432x768xbf16, #tpu.memory_space<vmem>>, vector<16x768xbf16>
    tpu.vector_store %arg13[%c16, %c0_10], %9 {strides = array<i32>} : memref<432x768xbf16, #tpu.memory_space<vmem>>, vector<16x768xbf16>,
    %c0_11 = arith.constant 0 : index
    %c111 = arith.constant 111 : index
    %11 = vector.load %arg12[%c0_11, %c111] : memref<64x1024xbf16, #tpu.memory_space<vmem>>, vector<16x768xbf16>
    %c32 = arith.constant 32 : index
    %c0_12 = arith.constant 0 : index
    %12 = vector.load %arg13[%c32, %c0_12] : memref<432x768xbf16, #tpu.memory_space<vmem>>, vector<16x768xbf16>
    tpu.vector_store %arg13[%c32, %c0_12], %11 {strides = array<i32>} : memref<432x768xbf16, #tpu.memory_space<vmem>>, vector<16x768xbf16>,
    %c0_13 = arith.constant 0 : index
    %c127 = arith.constant 127 : index
    %13 = vector.load %arg12[%c0_13, %c127] : memref<64x1024xbf16, #tpu.memory_space<vmem>>, vector<16x768xbf16>
    %c48 = arith.constant 48 : index
    %c0_14 = arith.constant 0 : index
    %14 = vector.load %arg13[%c48, %c0_14] : memref<432x768xbf16, #tpu.memory_space<vmem>>, vector<16x768xbf16>
    tpu.vector_store %arg13[%c48, %c0_14], %13 {strides = array<i32>} : memref<432x768xbf16, #tpu.memory_space<vmem>>, vector<16x768xbf16>,
    %c0_15 = arith.constant 0 : index
    %c128_16 = arith.constant 128 : index
    %15 = vector.load %arg12[%c0_15, %c128_16] : memref<64x1024xbf16, #tpu.memory_space<vmem>>, vector<16x768xbf16>
    %c64 = arith.constant 64 : index
    %c0_17 = arith.constant 0 : index
    %16 = vector.load %arg13[%c64, %c0_17] : memref<432x768xbf16, #tpu.memory_space<vmem>>, vector<16x768xbf16>
    tpu.vector_store %arg13[%c64, %c0_17], %15 {strides = array<i32>} : memref<432x768xbf16, #tpu.memory_space<vmem>>, vector<16x768xbf16>,
    %c0_18 = arith.constant 0 : index
    %c129 = arith.constant 129 : index
    %17 = vector.load %arg12[%c0_18, %c129] : memref<64x1024xbf16, #tpu.memory_space<vmem>>, vector<16x768xbf16>
    %c80 = arith.constant 80 : index
    %c0_19 = arith.constant 0 : index
    %18 = vector.load %arg13[%c80, %c0_19] : memref<432x768xbf16, #tpu.memory_space<vmem>>, vector<16x768xbf16>
    tpu.vector_store %arg13[%c80, %c0_19], %17 {strides = array<i32>} : memref<432x768xbf16, #tpu.memory_space<vmem>>, vector<16x768xbf16>,
    %c0_20 = arith.constant 0 : index
    %c145 = arith.constant 145 : index
    %19 = vector.load %arg12[%c0_20, %c145] : memref<64x1024xbf16, #tpu.memory_space<vmem>>, vector<16x768xbf16>
    %c96 = arith.constant 96 : index
    %c0_21 = arith.constant 0 : index
    %20 = vector.load %arg13[%c96, %c0_21] : memref<432x768xbf16, #tpu.memory_space<vmem>>, vector<16x768xbf16>
    tpu.vector_store %arg13[%c96, %c0_21], %19 {strides = array<i32>} : memref<432x768xbf16, #tpu.memory_space<vmem>>, vector<16x768xbf16>,
    %c0_22 = arith.constant 0 : index
    %c146 = arith.constant 146 : index
    %21 = vector.load %arg12[%c0_22, %c146] : memref<64x1024xbf16, #tpu.memory_space<vmem>>, vector<16x768xbf16>
    %c112 = arith.constant 112 : index
    %c0_23 = arith.constant 0 : index
    %22 = vector.load %arg13[%c112, %c0_23] : memref<432x768xbf16, #tpu.memory_space<vmem>>, vector<16x768xbf16>
    tpu.vector_store %arg13[%c112, %c0_23], %21 {strides = array<i32>} : memref<432x768xbf16, #tpu.memory_space<vmem>>, vector<16x768xbf16>,
    %c0_24 = arith.constant 0 : index
    %c147 = arith.constant 147 : index
    %23 = vector.load %arg12[%c0_24, %c147] : memref<64x1024xbf16, #tpu.memory_space<vmem>>, vector<16x768xbf16>
    %c128_25 = arith.constant 128 : index
    %c0_26 = arith.constant 0 : index
    %24 = vector.load %arg13[%c128_25, %c0_26] : memref<432x768xbf16, #tpu.memory_space<vmem>>, vector<16x768xbf16>
    tpu.vector_store %arg13[%c128_25, %c0_26], %23 {strides = array<i32>} : memref<432x768xbf16, #tpu.memory_space<vmem>>, vector<16x768xbf16>,
    %c0_27 = arith.constant 0 : index
    %c0_28 = arith.constant 0 : index
    %25 = vector.load %arg2[%c0_27, %c0_28] : memref<1x768xf32, #tpu.memory_space<vmem>>, vector<1x768xf32>
    %c0_29 = arith.constant 0 : index
    %c0_30 = arith.constant 0 : index
    %26 = vector.load %arg3[%c0_29, %c0_30] : memref<16x144xbf16, #tpu.memory_space<vmem>>, vector<16x144xbf16>
    %c0_31 = arith.constant 0 : index
    %c0_32 = arith.constant 0 : index
    %27 = vector.load %arg13[%c0_31, %c0_32] : memref<432x768xbf16, #tpu.memory_space<vmem>>, vector<144x768xbf16>
    %cst_33 = arith.constant dense<0.000000e+00> : vector<16x768xf32>
    %28 = tpu.matmul %26, %27, %cst_33 {dimension_numbers = #tpu.dot_dimension_numbers<[1], [0], [0], [1], [0, 0, 1, 1], [], []>} : vector<16x144xbf16>, vector<144x768xbf16>, vector<16x768xf32> -> vector<16x768xf32>
    %c0_34 = arith.constant 0 : index
    %c0_35 = arith.constant 0 : index
    %29 = vector.load %arg4[%c0_34, %c0_35] : memref<16x1xf32, #tpu.memory_space<vmem>>, vector<16x1xf32>
    %30 = vector.broadcast %29 : vector<16x1xf32> to vector<16x768xf32>
    %31 = arith.addf %28, %30 : vector<16x768xf32>
    %cst_36 = arith.constant 0.000000e+00 : f32
    %32 = vector.broadcast %cst_36 : f32 to vector<16x768xf32>
    %33 = arith.maximumf %31, %32 : vector<16x768xf32>
    %34 = vector.broadcast %25 : vector<1x768xf32> to vector<16x768xf32>
    %35 = arith.mulf %33, %34 : vector<16x768xf32>
    %36 = arith.truncf %35 : vector<16x768xf32> to vector<16x768xbf16>
    %c16_37 = arith.constant 16 : index
    %c128_38 = arith.constant 128 : index
    %37 = vector.load %arg12[%c16_37, %c128_38] : memref<64x1024xbf16, #tpu.memory_space<vmem>>, vector<16x768xbf16>
    tpu.vector_store %arg12[%c16_37, %c128_38], %36 {strides = array<i32>} : memref<64x1024xbf16, #tpu.memory_space<vmem>>, vector<16x768xbf16>,
    %c16_39 = arith.constant 16 : index
    %c109_40 = arith.constant 109 : index
    %38 = vector.load %arg12[%c16_39, %c109_40] : memref<64x1024xbf16, #tpu.memory_space<vmem>>, vector<16x768xbf16>
    %c144 = arith.constant 144 : index
    %c0_41 = arith.constant 0 : index
    %39 = vector.load %arg13[%c144, %c0_41] : memref<432x768xbf16, #tpu.memory_space<vmem>>, vector<16x768xbf16>
    tpu.vector_store %arg13[%c144, %c0_41], %38 {strides = array<i32>} : memref<432x768xbf16, #tpu.memory_space<vmem>>, vector<16x768xbf16>,
    %c16_42 = arith.constant 16 : index
    %c110_43 = arith.constant 110 : index
    %40 = vector.load %arg12[%c16_42, %c110_43] : memref<64x1024xbf16, #tpu.memory_space<vmem>>, vector<16x768xbf16>
    %c160 = arith.constant 160 : index
    %c0_44 = arith.constant 0 : index
    %41 = vector.load %arg13[%c160, %c0_44] : memref<432x768xbf16, #tpu.memory_space<vmem>>, vector<16x768xbf16>
    tpu.vector_store %arg13[%c160, %c0_44], %40 {strides = array<i32>} : memref<432x768xbf16, #tpu.memory_space<vmem>>, vector<16x768xbf16>,
    %c16_45 = arith.constant 16 : index
    %c111_46 = arith.constant 111 : index
    %42 = vector.load %arg12[%c16_45, %c111_46] : memref<64x1024xbf16, #tpu.memory_space<vmem>>, vector<16x768xbf16>
    %c176 = arith.constant 176 : index
    %c0_47 = arith.constant 0 : index
    %43 = vector.load %arg13[%c176, %c0_47] : memref<432x768xbf16, #tpu.memory_space<vmem>>, vector<16x768xbf16>
    tpu.vector_store %arg13[%c176, %c0_47], %42 {strides = array<i32>} : memref<432x768xbf16, #tpu.memory_space<vmem>>, vector<16x768xbf16>,
    %c16_48 = arith.constant 16 : index
    %c127_49 = arith.constant 127 : index
    %44 = vector.load %arg12[%c16_48, %c127_49] : memref<64x1024xbf16, #tpu.memory_space<vmem>>, vector<16x768xbf16>
    %c192 = arith.constant 192 : index
    %c0_50 = arith.constant 0 : index
    %45 = vector.load %arg13[%c192, %c0_50] : memref<432x768xbf16, #tpu.memory_space<vmem>>, vector<16x768xbf16>
    tpu.vector_store %arg13[%c192, %c0_50], %44 {strides = array<i32>} : memref<432x768xbf16, #tpu.memory_space<vmem>>, vector<16x768xbf16>,
    %c16_51 = arith.constant 16 : index
    %c128_52 = arith.constant 128 : index
    %46 = vector.load %arg12[%c16_51, %c128_52] : memref<64x1024xbf16, #tpu.memory_space<vmem>>, vector<16x768xbf16>
    %c208 = arith.constant 208 : index
    %c0_53 = arith.constant 0 : index
    %47 = vector.load %arg13[%c208, %c0_53] : memref<432x768xbf16, #tpu.memory_space<vmem>>, vector<16x768xbf16>
    tpu.vector_store %arg13[%c208, %c0_53], %46 {strides = array<i32>} : memref<432x768xbf16, #tpu.memory_space<vmem>>, vector<16x768xbf16>,
    %c16_54 = arith.constant 16 : index
    %c129_55 = arith.constant 129 : index
    %48 = vector.load %arg12[%c16_54, %c129_55] : memref<64x1024xbf16, #tpu.memory_space<vmem>>, vector<16x768xbf16>
    %c224 = arith.constant 224 : index
    %c0_56 = arith.constant 0 : index
    %49 = vector.load %arg13[%c224, %c0_56] : memref<432x768xbf16, #tpu.memory_space<vmem>>, vector<16x768xbf16>
    tpu.vector_store %arg13[%c224, %c0_56], %48 {strides = array<i32>} : memref<432x768xbf16, #tpu.memory_space<vmem>>, vector<16x768xbf16>,
    %c16_57 = arith.constant 16 : index
    %c145_58 = arith.constant 145 : index
    %50 = vector.load %arg12[%c16_57, %c145_58] : memref<64x1024xbf16, #tpu.memory_space<vmem>>, vector<16x768xbf16>
    %c240 = arith.constant 240 : index
    %c0_59 = arith.constant 0 : index
    %51 = vector.load %arg13[%c240, %c0_59] : memref<432x768xbf16, #tpu.memory_space<vmem>>, vector<16x768xbf16>
    tpu.vector_store %arg13[%c240, %c0_59], %50 {strides = array<i32>} : memref<432x768xbf16, #tpu.memory_space<vmem>>, vector<16x768xbf16>,
    %c16_60 = arith.constant 16 : index
    %c146_61 = arith.constant 146 : index
    %52 = vector.load %arg12[%c16_60, %c146_61] : memref<64x1024xbf16, #tpu.memory_space<vmem>>, vector<16x768xbf16>
    %c256 = arith.constant 256 : index
    %c0_62 = arith.constant 0 : index
    %53 = vector.load %arg13[%c256, %c0_62] : memref<432x768xbf16, #tpu.memory_space<vmem>>, vector<16x768xbf16>
    tpu.vector_store %arg13[%c256, %c0_62], %52 {strides = array<i32>} : memref<432x768xbf16, #tpu.memory_space<vmem>>, vector<16x768xbf16>,
    %c16_63 = arith.constant 16 : index
    %c147_64 = arith.constant 147 : index
    %54 = vector.load %arg12[%c16_63, %c147_64] : memref<64x1024xbf16, #tpu.memory_space<vmem>>, vector<16x768xbf16>
    %c272 = arith.constant 272 : index
    %c0_65 = arith.constant 0 : index
    %55 = vector.load %arg13[%c272, %c0_65] : memref<432x768xbf16, #tpu.memory_space<vmem>>, vector<16x768xbf16>
    tpu.vector_store %arg13[%c272, %c0_65], %54 {strides = array<i32>} : memref<432x768xbf16, #tpu.memory_space<vmem>>, vector<16x768xbf16>,
    %c0_66 = arith.constant 0 : index
    %c0_67 = arith.constant 0 : index
    %56 = vector.load %arg5[%c0_66, %c0_67] : memref<16x288xbf16, #tpu.memory_space<vmem>>, vector<16x288xbf16>
    %c0_68 = arith.constant 0 : index
    %c0_69 = arith.constant 0 : index
    %57 = vector.load %arg13[%c0_68, %c0_69] : memref<432x768xbf16, #tpu.memory_space<vmem>>, vector<288x768xbf16>
    %cst_70 = arith.constant dense<0.000000e+00> : vector<16x768xf32>
    %58 = tpu.matmul %56, %57, %cst_70 {dimension_numbers = #tpu.dot_dimension_numbers<[1], [0], [0], [1], [0, 0, 1, 1], [], []>} : vector<16x288xbf16>, vector<288x768xbf16>, vector<16x768xf32> -> vector<16x768xf32>
    %c0_71 = arith.constant 0 : index
    %c0_72 = arith.constant 0 : index
    %59 = vector.load %arg6[%c0_71, %c0_72] : memref<16x1xf32, #tpu.memory_space<vmem>>, vector<16x1xf32>
    %60 = vector.broadcast %59 : vector<16x1xf32> to vector<16x768xf32>
    %61 = arith.addf %58, %60 : vector<16x768xf32>
    %cst_73 = arith.constant 0.000000e+00 : f32
    %62 = vector.broadcast %cst_73 : f32 to vector<16x768xf32>
    %63 = arith.maximumf %61, %62 : vector<16x768xf32>
    %64 = vector.broadcast %25 : vector<1x768xf32> to vector<16x768xf32>
    %65 = arith.mulf %63, %64 : vector<16x768xf32>
    %66 = arith.truncf %65 : vector<16x768xf32> to vector<16x768xbf16>
    %c32_74 = arith.constant 32 : index
    %c128_75 = arith.constant 128 : index
    %67 = vector.load %arg12[%c32_74, %c128_75] : memref<64x1024xbf16, #tpu.memory_space<vmem>>, vector<16x768xbf16>
    tpu.vector_store %arg12[%c32_74, %c128_75], %66 {strides = array<i32>} : memref<64x1024xbf16, #tpu.memory_space<vmem>>, vector<16x768xbf16>,
    %c32_76 = arith.constant 32 : index
    %c109_77 = arith.constant 109 : index
    %68 = vector.load %arg12[%c32_76, %c109_77] : memref<64x1024xbf16, #tpu.memory_space<vmem>>, vector<16x768xbf16>
    %c288 = arith.constant 288 : index
    %c0_78 = arith.constant 0 : index
    %69 = vector.load %arg13[%c288, %c0_78] : memref<432x768xbf16, #tpu.memory_space<vmem>>, vector<16x768xbf16>
    tpu.vector_store %arg13[%c288, %c0_78], %68 {strides = array<i32>} : memref<432x768xbf16, #tpu.memory_space<vmem>>, vector<16x768xbf16>,
    %c32_79 = arith.constant 32 : index
    %c110_80 = arith.constant 110 : index
    %70 = vector.load %arg12[%c32_79, %c110_80] : memref<64x1024xbf16, #tpu.memory_space<vmem>>, vector<16x768xbf16>
    %c304 = arith.constant 304 : index
    %c0_81 = arith.constant 0 : index
    %71 = vector.load %arg13[%c304, %c0_81] : memref<432x768xbf16, #tpu.memory_space<vmem>>, vector<16x768xbf16>
    tpu.vector_store %arg13[%c304, %c0_81], %70 {strides = array<i32>} : memref<432x768xbf16, #tpu.memory_space<vmem>>, vector<16x768xbf16>,
    %c32_82 = arith.constant 32 : index
    %c111_83 = arith.constant 111 : index
    %72 = vector.load %arg12[%c32_82, %c111_83] : memref<64x1024xbf16, #tpu.memory_space<vmem>>, vector<16x768xbf16>
    %c320 = arith.constant 320 : index
    %c0_84 = arith.constant 0 : index
    %73 = vector.load %arg13[%c320, %c0_84] : memref<432x768xbf16, #tpu.memory_space<vmem>>, vector<16x768xbf16>
    tpu.vector_store %arg13[%c320, %c0_84], %72 {strides = array<i32>} : memref<432x768xbf16, #tpu.memory_space<vmem>>, vector<16x768xbf16>,
    %c32_85 = arith.constant 32 : index
    %c127_86 = arith.constant 127 : index
    %74 = vector.load %arg12[%c32_85, %c127_86] : memref<64x1024xbf16, #tpu.memory_space<vmem>>, vector<16x768xbf16>
    %c336 = arith.constant 336 : index
    %c0_87 = arith.constant 0 : index
    %75 = vector.load %arg13[%c336, %c0_87] : memref<432x768xbf16, #tpu.memory_space<vmem>>, vector<16x768xbf16>
    tpu.vector_store %arg13[%c336, %c0_87], %74 {strides = array<i32>} : memref<432x768xbf16, #tpu.memory_space<vmem>>, vector<16x768xbf16>,
    %c32_88 = arith.constant 32 : index
    %c128_89 = arith.constant 128 : index
    %76 = vector.load %arg12[%c32_88, %c128_89] : memref<64x1024xbf16, #tpu.memory_space<vmem>>, vector<16x768xbf16>
    %c352 = arith.constant 352 : index
    %c0_90 = arith.constant 0 : index
    %77 = vector.load %arg13[%c352, %c0_90] : memref<432x768xbf16, #tpu.memory_space<vmem>>, vector<16x768xbf16>
    tpu.vector_store %arg13[%c352, %c0_90], %76 {strides = array<i32>} : memref<432x768xbf16, #tpu.memory_space<vmem>>, vector<16x768xbf16>,
    %c32_91 = arith.constant 32 : index
    %c129_92 = arith.constant 129 : index
    %78 = vector.load %arg12[%c32_91, %c129_92] : memref<64x1024xbf16, #tpu.memory_space<vmem>>, vector<16x768xbf16>
    %c368 = arith.constant 368 : index
    %c0_93 = arith.constant 0 : index
    %79 = vector.load %arg13[%c368, %c0_93] : memref<432x768xbf16, #tpu.memory_space<vmem>>, vector<16x768xbf16>
    tpu.vector_store %arg13[%c368, %c0_93], %78 {strides = array<i32>} : memref<432x768xbf16, #tpu.memory_space<vmem>>, vector<16x768xbf16>,
    %c32_94 = arith.constant 32 : index
    %c145_95 = arith.constant 145 : index
    %80 = vector.load %arg12[%c32_94, %c145_95] : memref<64x1024xbf16, #tpu.memory_space<vmem>>, vector<16x768xbf16>
    %c384 = arith.constant 384 : index
    %c0_96 = arith.constant 0 : index
    %81 = vector.load %arg13[%c384, %c0_96] : memref<432x768xbf16, #tpu.memory_space<vmem>>, vector<16x768xbf16>
    tpu.vector_store %arg13[%c384, %c0_96], %80 {strides = array<i32>} : memref<432x768xbf16, #tpu.memory_space<vmem>>, vector<16x768xbf16>,
    %c32_97 = arith.constant 32 : index
    %c146_98 = arith.constant 146 : index
    %82 = vector.load %arg12[%c32_97, %c146_98] : memref<64x1024xbf16, #tpu.memory_space<vmem>>, vector<16x768xbf16>
    %c400 = arith.constant 400 : index
    %c0_99 = arith.constant 0 : index
    %83 = vector.load %arg13[%c400, %c0_99] : memref<432x768xbf16, #tpu.memory_space<vmem>>, vector<16x768xbf16>
    tpu.vector_store %arg13[%c400, %c0_99], %82 {strides = array<i32>} : memref<432x768xbf16, #tpu.memory_space<vmem>>, vector<16x768xbf16>,
    %c32_100 = arith.constant 32 : index
    %c147_101 = arith.constant 147 : index
    %84 = vector.load %arg12[%c32_100, %c147_101] : memref<64x1024xbf16, #tpu.memory_space<vmem>>, vector<16x768xbf16>
    %c416 = arith.constant 416 : index
    %c0_102 = arith.constant 0 : index
    %85 = vector.load %arg13[%c416, %c0_102] : memref<432x768xbf16, #tpu.memory_space<vmem>>, vector<16x768xbf16>
    tpu.vector_store %arg13[%c416, %c0_102], %84 {strides = array<i32>} : memref<432x768xbf16, #tpu.memory_space<vmem>>, vector<16x768xbf16>,
    %c0_103 = arith.constant 0 : index
    %c0_104 = arith.constant 0 : index
    %86 = vector.load %arg7[%c0_103, %c0_104] : memref<16x432xbf16, #tpu.memory_space<vmem>>, vector<16x432xbf16>
    %c0_105 = arith.constant 0 : index
    %c0_106 = arith.constant 0 : index
    %87 = vector.load %arg13[%c0_105, %c0_106] : memref<432x768xbf16, #tpu.memory_space<vmem>>, vector<432x768xbf16>
    %cst_107 = arith.constant dense<0.000000e+00> : vector<16x768xf32>
    %88 = tpu.matmul %86, %87, %cst_107 {dimension_numbers = #tpu.dot_dimension_numbers<[1], [0], [0], [1], [0, 0, 1, 1], [], []>} : vector<16x432xbf16>, vector<432x768xbf16>, vector<16x768xf32> -> vector<16x768xf32>
    %c0_108 = arith.constant 0 : index
    %c0_109 = arith.constant 0 : index
    %89 = vector.load %arg8[%c0_108, %c0_109] : memref<16x1xf32, #tpu.memory_space<vmem>>, vector<16x1xf32>
    %90 = vector.broadcast %89 : vector<16x1xf32> to vector<16x768xf32>
    %91 = arith.addf %88, %90 : vector<16x768xf32>
    %cst_110 = arith.constant 0.000000e+00 : f32
    %92 = vector.broadcast %cst_110 : f32 to vector<16x768xf32>
    %93 = arith.maximumf %91, %92 : vector<16x768xf32>
    %94 = vector.broadcast %25 : vector<1x768xf32> to vector<16x768xf32>
    %95 = arith.mulf %93, %94 : vector<16x768xf32>
    %96 = arith.truncf %95 : vector<16x768xf32> to vector<16x768xbf16>
    %c48_111 = arith.constant 48 : index
    %c128_112 = arith.constant 128 : index
    %97 = vector.load %arg12[%c48_111, %c128_112] : memref<64x1024xbf16, #tpu.memory_space<vmem>>, vector<16x768xbf16>
    tpu.vector_store %arg12[%c48_111, %c128_112], %96 {strides = array<i32>} : memref<64x1024xbf16, #tpu.memory_space<vmem>>, vector<16x768xbf16>,
    %c0_113 = arith.constant 0 : index
    %c0_114 = arith.constant 0 : index
    %98 = vector.load %arg9[%c0_113, %c0_114] : memref<16x64xbf16, #tpu.memory_space<vmem>>, vector<16x64xbf16>
    %c0_115 = arith.constant 0 : index
    %c128_116 = arith.constant 128 : index
    %99 = vector.load %arg12[%c0_115, %c128_116] : memref<64x1024xbf16, #tpu.memory_space<vmem>>, vector<64x768xbf16>
    %cst_117 = arith.constant dense<0.000000e+00> : vector<16x768xf32>
    %100 = tpu.matmul %98, %99, %cst_117 {dimension_numbers = #tpu.dot_dimension_numbers<[1], [0], [0], [1], [0, 0, 1, 1], [], []>} : vector<16x64xbf16>, vector<64x768xbf16>, vector<16x768xf32> -> vector<16x768xf32>
    %c0_118 = arith.constant 0 : index
    %c0_119 = arith.constant 0 : index
    %101 = vector.load %arg10[%c0_118, %c0_119] : memref<16x1xf32, #tpu.memory_space<vmem>>, vector<16x1xf32>
    %102 = vector.broadcast %101 : vector<16x1xf32> to vector<16x768xf32>
    %103 = arith.addf %100, %102 : vector<16x768xf32>
    %c0_120 = arith.constant 0 : index
    %c0_121 = arith.constant 0 : index
    %c0_122 = arith.constant 0 : index
    %104 = vector.load %arg1[%c0_120, %c0_121, %c0_122] : memref<1x16x768xf32, #tpu.memory_space<vmem>>, vector<1x16x768xf32>
    %105 = vector.shape_cast %104 : vector<1x16x768xf32> to vector<16x768xf32>
    %106 = arith.addf %103, %105 : vector<16x768xf32>
    %c0_123 = arith.constant 0 : index
    %c0_124 = arith.constant 0 : index
    %c0_125 = arith.constant 0 : index
    %107 = vector.load %arg11[%c0_123, %c0_124, %c0_125] : memref<1x16x768xf32, #tpu.memory_space<vmem>>, vector<1x16x768xf32>
    %108 = vector.shape_cast %107 : vector<1x16x768xf32> to vector<16x768xf32>
    %109 = vector.shape_cast %106 : vector<16x768xf32> to vector<1x16x768xf32>
    tpu.vector_store %arg11[%c0_123, %c0_124, %c0_125], %109 {strides = array<i32>} : memref<1x16x768xf32, #tpu.memory_space<vmem>>, vector<1x16x768xf32>,
    return
  }
  func.func @transform_0(%arg0: i32) -> (i32, i32, i32) {
    %c0_i32 = arith.constant 0 : i32
    %c0_i32_0 = arith.constant 0 : i32
    %c0_i32_1 = arith.constant 0 : i32
    return %arg0, %c0_i32, %c0_i32_0 : i32, i32, i32
  }
  func.func @transform_1(%arg0: i32) -> (i32, i32) {
    %c0_i32 = arith.constant 0 : i32
    %c0_i32_0 = arith.constant 0 : i32
    %c0_i32_1 = arith.constant 0 : i32
    return %c0_i32, %c0_i32_0 : i32, i32
  }
  func.func @transform_2(%arg0: i32) -> (i32, i32) {
    %c0_i32 = arith.constant 0 : i32
    %c0_i32_0 = arith.constant 0 : i32
    %c0_i32_1 = arith.constant 0 : i32
    return %c0_i32, %c0_i32_0 : i32, i32
  }
  func.func @transform_3(%arg0: i32) -> (i32, i32) {
    %c0_i32 = arith.constant 0 : i32
    %c0_i32_0 = arith.constant 0 : i32
    %c0_i32_1 = arith.constant 0 : i32
    return %c0_i32, %c0_i32_0 : i32, i32
  }
  func.func @transform_4(%arg0: i32) -> (i32, i32) {
    %c0_i32 = arith.constant 0 : i32
    %c0_i32_0 = arith.constant 0 : i32
    %c0_i32_1 = arith.constant 0 : i32
    return %c0_i32, %c0_i32_0 : i32, i32
  }
  func.func @transform_5(%arg0: i32) -> (i32, i32) {
    %c0_i32 = arith.constant 0 : i32
    %c0_i32_0 = arith.constant 0 : i32
    %c0_i32_1 = arith.constant 0 : i32
    return %c0_i32, %c0_i32_0 : i32, i32
  }
  func.func @transform_6(%arg0: i32) -> (i32, i32) {
    %c0_i32 = arith.constant 0 : i32
    %c0_i32_0 = arith.constant 0 : i32
    %c0_i32_1 = arith.constant 0 : i32
    return %c0_i32, %c0_i32_0 : i32, i32
  }
  func.func @transform_7(%arg0: i32) -> (i32, i32) {
    %c0_i32 = arith.constant 0 : i32
    %c0_i32_0 = arith.constant 0 : i32
    %c0_i32_1 = arith.constant 0 : i32
    return %c0_i32, %c0_i32_0 : i32, i32
  }
  func.func @transform_8(%arg0: i32) -> (i32, i32) {
    %c0_i32 = arith.constant 0 : i32
    %c0_i32_0 = arith.constant 0 : i32
    %c0_i32_1 = arith.constant 0 : i32
    return %c0_i32, %c0_i32_0 : i32, i32
  }
  func.func @transform_9(%arg0: i32) -> (i32, i32) {
    %c0_i32 = arith.constant 0 : i32
    %c0_i32_0 = arith.constant 0 : i32
    %c0_i32_1 = arith.constant 0 : i32
    return %c0_i32, %c0_i32_0 : i32, i32
  }
  func.func @transform_10(%arg0: i32) -> (i32, i32, i32) {
    %c0_i32 = arith.constant 0 : i32
    %c0_i32_0 = arith.constant 0 : i32
    %c0_i32_1 = arith.constant 0 : i32
    return %arg0, %c0_i32, %c0_i32_0 : i32, i32, i32
  }
}

</mosaic_0001>

<bundles_post_ra>
// kernel: tpu_custom_call.1
= control target key start
LH: loop header
LB: loop body
LE: loop exit
PB: predicated region body
PF: predicated region fallthrough
CT: control target
= control target key end

     0   :  { %15 = vsyncpa [#allocation5], 0  ;;  %s5070_s0 = inlined_call_operand.hbm [shape: f32[2,16,768], index: 0, kind: input, shape index: {}]   ;;  %s5071_s1 = inlined_call_operand.hbm [shape: f32[1,768], index: 1, kind: input, shape index: {}]   ;;  %s5072_s2 = inlined_call_operand.vmem [shape: bf16[16,144], index: 2, kind: input, shape index: {}]   ;;  %s5073_s3 = inlined_call_operand.vmem [shape: f32[16,1], index: 3, kind: input, shape index: {}]   ;;  %s5074_s4 = inlined_call_operand.vmem [shape: bf16[16,288], index: 4, kind: input, shape index: {}]   ;;  %s5075_s5 = inlined_call_operand.vmem [shape: f32[16,1], index: 5, kind: input, shape index: {}]   ;;  %s5076_s6 = inlined_call_operand.vmem [shape: bf16[16,432], index: 6, kind: input, shape index: {}]   ;;  %s5077_s7 = inlined_call_operand.vmem [shape: f32[16,1], index: 7, kind: input, shape index: {}]   ;;  %s5078_s8 = inlined_call_operand.vmem [shape: bf16[16,64], index: 8, kind: input, shape index: {}]   ;;  %s5079_s9 = inlined_call_operand.vmem [shape: f32[16,1], index: 9, kind: input, shape index: {}]   ;;  %s5080_s10 = inlined_call_operand.hbm [shape: f32[2,16,768], index: 10, kind: output, shape index: {}]  }
   0x1   :  { %17 = vsyncpa [#allocation5 + $0x1], 0 }
   0x2   :  { %18 = vsyncpa [#allocation8], 0 }
   0x3   :  { %19 = vsyncpa [#allocation6], 0 }
   0x4   :  { %21 = vsyncpa [#allocation6 + $0x1], 0  ;;  %s3462_s13 = smov 0   ;;  %s3464_s14 = smov 0  }
   0x5   :  { %s3466_s15 = smov 0   ;;  %s3468_s16 = smov 0  }
   0x6 LB: > { %5164 = sst [smem:[#allocation13_spill]] %s3385_s15  ;;  %s3483_s17 = sadd.s32 4294967295, %s3389_s16   ;;  %s3389_s16 = sphi %s3468_s16, %s5302_s16   ;;  %s3385_s15 = sphi %s3466_s15, %s5304_s15   ;;  %s3381_s14 = sphi %s3464_s14, %s5306_s14   ;;  %s3377_s13 = sphi %s3462_s13, %s5305_s13  }
   0x7   : > { %s3091_s18 = sadd.s32 4294967294, %s3389_s16   ;;  %s3487_s19 = sadd.s32 1, %s3389_s16  }
   0x8   : > { %5165 = sst [smem:[#allocation14_spill]] %s3487_s19  ;;  %s34_s20 = sadd.s32 1, %s3385_s15 }
   0x9   : > { %s31_s21 = ssub.s32 %s3389_s16, %s3487_s19  ;;  %p41_p0 = scmp.ne.s32.totalorder %s3385_s15, %s3381_s14 }
   0xa   : > { %p32_p1 = scmp.eq.s32.totalorder %s31_s21, 0  ;;  %p42_p2 = scmp.eq.s32.totalorder %s3389_s16, 0 }
   0xb   : > { %p47_p3 = scmp.ne.s32.totalorder %s3381_s14, %s3377_s13  ;;  %p5081_p4 = scmp.eq.s32.totalorder %s3483_s17, 0 }
   0xc   : > { %s3499_s22 = scalar_select %p32_p1, %s3385_s15, %s34_s20  }
   0xd   : > { %p3501_p5 = por %p42_p2, %p41_p0  ;;  %p3507_p6 = por %p5081_p4, %p47_p3 }
   0xe   : > { %5166 = sst [smem:[#allocation15_spill]] %s3499_s22  ;;  %p260_p7 = scmp.eq.s32.totalorder %s3483_s17, 1 }
   0xf   : > { %s5168_s24 = scalar_select %p3507_p6, 1, 0 }
  0x10   : > { %p266_p8 = scmp.eq.s32.totalorder %s3091_s18, 1  ;;  %p3092_p9 = scmp.ge.s32.totalorder %s3389_s16, 1 }
  0x11   : > { %p273_p10 = scmp.lt.s32.totalorder %s3389_s16, 3  ;;  %p3514_p11 = por %p260_p7, %p41_p0 }
  0x12   : > { %p3518_p12 = por %p266_p8, %p47_p3  ;;  %s3391_s28 = smov [#allocation7]  }
  0x13   : > { %s5169_s25 = scalar_select %p3514_p11, 1, 0 }
  0x14   : > { %s5170_s26 = scalar_select %p3518_p12, 1, 0 }
  0x15   : > { %p3522_p13 = pnand %p3092_p9, %p273_p10  ;;  %s286_s29 = sshll.u32 %s3391_s28, 4  ;;  %s287_s29 = int_to_ptr.vmem [resolvable:$true] %s286_s29 }
  0x16   : > { %5171 = sst [smem:[#allocation16_spill]] %s5170_s26  ;;  %p3196_p4 = scmp.lt.s32.totalorder %s3389_s16, 2 }
  0x17   : > { %s5172_s27 = scalar_select %p3522_p13, 1, 0 }
  0x18   : > { %p3183_p2 = pneg %p3522_p13  ;;  %p5173_p0 = scmp.eq.s32.totalorder %s3483_s17, 0 }
  0x19   : > { %s321_s11 = sand.u32 1, %s3385_s15   ;;  %p3539_p3 = pnand %p3196_p4, %p3501_p5 }
  0x1a   : > { %p3532_p7 = pnand %p3183_p2, %p5173_p0  ;;  %s3171_s18 = smul.u32 96, %s321_s11 }
  0x1b   : > { %s5175_s12 = scalar_select %p3539_p3, 1, 0 }
  0x1c   : > { %s3261_s22 = scalar_lea.hbm %s5071_s1, 96  ;;  %p3263_p9 = pneg %p3532_p7 }
  0x1d   : > { %p3262_p8 = scmp.ne.s32.totalorder %s5071_s1, %s3261_s22  ;;  %p3268_p4 = scmp.lt.u32.totalorder %s3261_s22, %s5071_s1 }
  0x1f   : > { %p3264_p10 = pnand %p3263_p9, %p3262_p8 }
  0x21   : > { %p3265_p2 = pneg %p3264_p10 }
  0x23   : > { %p3270_p5 = pnand %p3268_p4, %p3265_p2 }
  0x25   : > { %3273 = shalt.err (!%p3270_p5)
}
  0x26   : > { %s3274_s23 = scalar_lea.vmem %s287_s29, 96  ;;  %p3282_p11 = scmp.lt.s32.totalorder %s287_s29, %s287_s29 }
  0x27   : > { %p3275_p0 = scmp.ne.s32.totalorder %s287_s29, %s3274_s23  ;;  %p3283_p6 = scmp.lt.s32.totalorder %s3274_s23, %s3274_s23 }
  0x29   : > { %p3277_p1 = pnand %p3275_p0, %p3263_p9  ;;  %p3284_p13 = por %p3283_p6, %p3282_p11 }
  0x2b   : > { %p3278_p12 = pneg %p3277_p1 }
  0x2d   : > { %p3285_p3 = pnand %p3284_p13, %p3278_p12 }
  0x2f   : > { %3288 = shalt.err (!%p3285_p3)
}
  0x30   : > { %3186 = dma.hbm_to_vmem [thread:$0]  (!%p3532_p7), %s5071_s1, 96, %s287_s29, [#allocation8]  }
  0x31   : > { %s3172_s15 = smul.u32 1536, %s3389_s16  ;;  %s325_s22 = scalar_lea.vmem [#allocation4], %s3171_s18 }
  0x32   : > { %s332_s26 = sshll.u32 %s325_s22, 4  ;;  %s3567_s30 = scalar_lea.sflag [#allocation5], %s321_s11  ;;  %s3560_s26 = int_to_ptr.vmem [resolvable:$true] %s332_s26 }
  0x33   : > { %s3565_s23 = scalar_lea.hbm %s5070_s0, %s3172_s15  ;;  %p5176_p11 = scmp.ne.s32.totalorder %s5175_s12, 0 }
  0x34   : > { %s3289_s19 = scalar_lea.hbm %s3565_s23, 1536  ;;  %s3294_s20 = scalar_lea.hbm %s5070_s0, 3072 }
  0x35   : > { %p3290_p6 = scmp.ne.s32.totalorder %s3565_s23, %s3289_s19  ;;  %p3291_p12 = pneg %p5176_p11 }
  0x36   : > { %p3295_p7 = scmp.lt.u32.totalorder %s3565_s23, %s5070_s0  ;;  %p3296_p3 = scmp.lt.u32.totalorder %s3294_s20, %s3289_s19 }
  0x37   : > { %p3292_p13 = pnand %p3291_p12, %p3290_p6  ;;  %p3298_p9 = scmp.lt.u32.totalorder %s3289_s19, %s3565_s23 }
  0x38   : > { %p3297_p8 = por %p3296_p3, %p3295_p7 }
  0x39   : > { %p3293_p1 = pneg %p3292_p13 }
  0x3a   : > { %p3299_p10 = por %p3298_p9, %p3297_p8 }
  0x3c   : > { %p3300_p2 = pnand %p3299_p10, %p3293_p1 }
  0x3e   : > { %3303 = shalt.err (!%p3300_p2)
}
  0x3f   : > { %s3304_s11 = scalar_lea.vmem %s3560_s26, 1536  ;;  %s3392_s21 = smov [#allocation4]  }
  0x40   : > { %p3305_p4 = scmp.ne.s32.totalorder %s3560_s26, %s3304_s11  ;;  %s3309_s28 = sshll.u32 %s3392_s21, 4  ;;  %s3310_s28 = int_to_ptr.vmem [resolvable:$false] %s3309_s28 }
  0x41   : > { %s3311_s29 = scalar_lea.vmem %s3310_s28, 3072  ;;  %p3312_p6 = scmp.lt.s32.totalorder %s3560_s26, %s3310_s28 }
  0x42   : > { %p3307_p5 = pnand %p3305_p4, %p3291_p12  ;;  %p3313_p13 = scmp.lt.s32.totalorder %s3311_s29, %s3304_s11 }
  0x44   : > { %p3308_p0 = pneg %p3307_p5  ;;  %p3314_p7 = por %p3313_p13, %p3312_p6 }
  0x46   : > { %p3315_p3 = pnand %p3314_p7, %p3308_p0 }
  0x48   : > { %3318 = shalt.err (!%p3315_p3)
}
  0x49   : > { %s3393_s19 = smov 768   ;;  %s3394_s18 = smov 48  }
  0x4a   : > { %3190 = dma.hbm_to_vmem [thread:$0]  (!%p5176_p11), %s3565_s23, 1536, %s3560_s26, %s3567_s30, %s3393_s19, %s3393_s19, %s3394_s18  }
  0x4b   : > { %p5177_p12 = scmp.ne.s32.totalorder %s5172_s27, 0 }
  0x4d   : > { %344 = sbr.rel (%p5177_p12) target bundleno = 1619 (0x653), region = 60 }
  0x54   : > { %s3598_s20 = sand.u32 1, %s3381_s14   ;;  %p5178_p1 = scmp.ne.s32.totalorder %s5168_s24, 0 }
  0x55   : > { %s3173_s15 = smul.u32 96, %s3598_s20  ;;  %s347_s22 = scalar_lea.sflag [#allocation5], %s3598_s20 }
  0x57   : > { %s3604_s11 = scalar_lea.vmem [#allocation4], %s3173_s15 }
  0x58   : > { %3364 = dma.done.wait (%p5178_p1), %s347_s22, 1536  }
  0x59   : > { %3366 = vsyncadd (%p5178_p1), %s347_s22, 4294965760  ;;  %p5179_p11 = scmp.eq.s32.totalorder %s3483_s17, 0 }
  0x5b   : > { %3368 = dma.done.wait (%p5179_p11), [#allocation8], 96   ;;  %p5180_p8 = pmov %p5179_p11 }
  0x5c   : > { %v5090_v0 = vmov 0   ;;  %s3396_s27 = smov 19   ;;  %s3397_s24 = smov 18   ;;  %v400_v1 = vld [vmem:[%s3604_s11] sm:$0xff]  ;;  %v406_v2 = vld [vmem:[%s3604_s11 + $0x30] sm:$0xff]  ;;  %v401_v3 = vld [vmem:[%s3604_s11 + $0x8] sm:$0xff] }
  0x5d   : > { %3370 = vsyncadd (%p5180_p8), [#allocation8], 4294967200  ;;  %438 = vrot.lane.b32.xlu1 %v5090_v0, %s3396_s27  ;;  %3245 = vset.pattern.permute.xlu0 %v5090_v0  ;;  %v3623_v4 = vpack.c.bf16 %v406_v2, %v400_v1  ;;  %v407_v5 = vld [vmem:[%s3604_s11 + $0x38] sm:$0xff]  ;;  %s3398_s12 = smov 17   ;;  %s3399_s26 = smov 1   ;;  %v402_v7 = vld [vmem:[%s3604_s11 + $0x10] sm:$0xff] }
  0x5e   : > { %3246 = vset.pattern.permute.xlu1 %v5090_v0  ;;  %v3630_v6 = vpack.c.bf16 %v407_v5, %v401_v3  ;;  %v408_v8 = vld [vmem:[%s3604_s11 + $0x40] sm:$0xff]  ;;  %v403_v10 = vld [vmem:[%s3604_s11 + $0x18] sm:$0xff]  ;;  %v409_v11 = vld [vmem:[%s3604_s11 + $0x48] sm:$0xff]  ;;  %s3400_s23 = smov 127   ;;  %s3401_s30 = smov 111   ;;  %vm890_vm0 = vcmask 130048  }
  0x5f   : > { %5181 = vst [vmem:[#allocation17_spill] sm:$0xff] %v3623_v4  ;;  %440 = vrot.lane.b32.xlu0 %v3623_v4, %s3396_s27  ;;  %v3646_v9 = vpack.c.bf16 %v408_v8, %v402_v7  ;;  %v3654_v12 = vpack.c.bf16 %v409_v11, %v403_v10  ;;  %s3402_s21 = smov 110   ;;  %s3403_s28 = smov 109   ;;  %v3687_v13 = vld [vmem:[%s5072_s2 + $0x4] ss:$8 sps:$4 sm:$0xff]   ;;  %v410_v15 = vld [vmem:[%s3604_s11 + $0x50] sm:$0xff] }
  0x60   : > { %5182 = vst [vmem:[#allocation18_spill] sm:$0xff] %v3630_v6  ;;  %3100 = vmatprep.mubr.msk.bf16.mxu0 %vm890_vm0, %v3687_v13  ;;  %3101 = vmatprep.mubr.msk.bf16.mxu1 %vm890_vm0, %v3687_v13  ;;  %v404_v14 = vld [vmem:[%s3604_s11 + $0x20] sm:$0xff]  ;;  %v405_v17 = vld [vmem:[%s3604_s11 + $0x28] sm:$0xff]  ;;  %v411_v18 = vld [vmem:[%s3604_s11 + $0x58] sm:$0xff]  ;;  %vm452_vm1 = vcmask 154624   ;;  %vm499_vm2 = vcmask 146432  }
  0x61   : > { %485 = vrot.lane.b32.xlu1 %v5090_v0, %s3397_s24  ;;  %5183 = vst [vmem:[#allocation19_spill] sm:$0xff] %v3646_v9  ;;  %5184 = vst [vmem:[#allocation20_spill] sm:$0xff] %v3654_v12  ;;  %v3703_v16 = vpack.c.bf16 %v410_v15, %v404_v14  ;;  %v3719_v19 = vpack.c.bf16 %v411_v18, %v405_v17  ;;  %vm546_vm3 = vcmask 138240   ;;  %vm593_vm4 = vcmask 7168   ;;  %v870_v38 = vld [vmem:[%s5073_s3 + $0x8] sm:$0xff]  ;;  %v869_v39 = vld [vmem:[%s5073_s3] sm:$0xff] }
  0x62   : > { %vm652_vm5 = vcmask 1039360   ;;  %vm699_vm6 = vcmask 908288   ;;  %vm746_vm7 = vcmask 900096   ;;  %vm793_vm8 = vcmask 891904   ;;  %p5298_p10 = scmp.ne.s32.totalorder %s5169_s25, 0 }
  0x63   : > { %442 = vrot.lane.b32.xlu0 %v3630_v6, %s3396_s27  ;;  %vm1609_vm9 = vcmask 261120   ;;  %vm2484_vm10 = vcmask 392192   ;;  %vm2825_vm11 = vcmask 523264  }
  0x65   : > { %487 = vrot.lane.b32.xlu1 %v3623_v4, %s3397_s24 }
  0x67   : > { %489 = vrot.lane.b32.xlu0 %v3630_v6, %s3397_s24 }
  0x69   : > { %536 = vrot.lane.b32.xlu1 %v3630_v6, %s3398_s12 }
  0x6b   : > { %534 = vrot.lane.b32.xlu0 %v3623_v4, %s3398_s12 }
  0x6d   : > { %581 = vrot.lane.b32.xlu1 %v3623_v4, %s3399_s26 }
  0x6f   : > { %532 = vrot.lane.b32.xlu0 %v5090_v0, %s3398_s12 }
  0x71   : > { %579 = vrot.lane.b32.xlu1 %v5090_v0, %s3399_s26 }
  0x73   : > { %583 = vrot.lane.b32.xlu0 %v3630_v6, %s3399_s26 }
  0x75   : > { %642 = vrot.lane.b32.xlu1 %v3646_v9, %s3400_s23 }
  0x77   : > { %640 = vrot.lane.b32.xlu0 %v3630_v6, %s3400_s23 }
  0x79   : > { %446 = vrot.lane.b32.xlu1 %v3654_v12, %s3396_s27 }
  0x7b   : > { %444 = vrot.lane.b32.xlu0 %v3646_v9, %s3396_s27 }
  0x7d   : > { %687 = vrot.lane.b32.xlu1 %v3630_v6, %s3401_s30 }
  0x7f   : > { %638 = vrot.lane.b32.xlu0 %v3623_v4, %s3400_s23 }
  0x81   : > { %491 = vrot.lane.b32.xlu1 %v3646_v9, %s3397_s24 }
  0x83   : > { %689 = vrot.lane.b32.xlu0 %v3646_v9, %s3401_s30 }
  0x85   : > { %685 = vrot.lane.b32.xlu1 %v3623_v4, %s3401_s30 }
  0x87   : > { %493 = vrot.lane.b32.xlu0 %v3654_v12, %s3397_s24 }
  0x89   : > { %736 = vrot.lane.b32.xlu1 %v3646_v9, %s3402_s21 }
  0x8b   : > { %734 = vrot.lane.b32.xlu0 %v3630_v6, %s3402_s21 }
  0x8d   : > { %540 = vrot.lane.b32.xlu1 %v3654_v12, %s3398_s12 }
  0x8f   : > { %538 = vrot.lane.b32.xlu0 %v3646_v9, %s3398_s12 }
  0x91   : > { %781 = vrot.lane.b32.xlu1 %v3630_v6, %s3403_s28 }
  0x93   : > { %732 = vrot.lane.b32.xlu0 %v3623_v4, %s3402_s21 }
  0x95   : > { %585 = vrot.lane.b32.xlu1 %v3646_v9, %s3399_s26 }
  0x97   : > { %783 = vrot.lane.b32.xlu0 %v3646_v9, %s3403_s28 }
  0x99   : > { %779 = vrot.lane.b32.xlu1 %v3623_v4, %s3403_s28 }
  0x9b   : > { %587 = vrot.lane.b32.xlu0 %v3654_v12, %s3399_s26 }
  0x9d   : > { %646 = vrot.lane.b32.xlu1 %v3703_v16, %s3400_s23 }
  0x9f   : > { %644 = vrot.lane.b32.xlu0 %v3654_v12, %s3400_s23 }
  0xa1   : > { %693 = vrot.lane.b32.xlu1 %v3703_v16, %s3401_s30 }
  0xa3   : > { %691 = vrot.lane.b32.xlu0 %v3654_v12, %s3401_s30 }
  0xa5   : > { %740 = vrot.lane.b32.xlu1 %v3703_v16, %s3402_s21 }
  0xa7   : > { %738 = vrot.lane.b32.xlu0 %v3654_v12, %s3402_s21 }
  0xa9   : > { %450 = vrot.lane.b32.xlu1 %v3719_v19, %s3396_s27 }
  0xab   : > { %448 = vrot.lane.b32.xlu0 %v3703_v16, %s3396_s27 }
  0xad   : > { %787 = vrot.lane.b32.xlu1 %v3703_v16, %s3403_s28 }
  0xaf   : > { %785 = vrot.lane.b32.xlu0 %v3654_v12, %s3403_s28 }
  0xb1   : > { %497 = vrot.lane.b32.xlu1 %v3719_v19, %s3397_s24 }
  0xb3   : > { %495 = vrot.lane.b32.xlu0 %v3703_v16, %s3397_s24 }
  0xb5   : > { %544 = vrot.lane.b32.xlu1 %v3719_v19, %s3398_s12 }
  0xb7   : > { %542 = vrot.lane.b32.xlu0 %v3703_v16, %s3398_s12 }
  0xb9   : > { %591 = vrot.lane.b32.xlu1 %v3719_v19, %s3399_s26 }
  0xbb   : > { %589 = vrot.lane.b32.xlu0 %v3703_v16, %s3399_s26 }
  0xbd   : > { %650 = vrot.lane.b32.xlu1 %v5090_v0, %s3400_s23 }
  0xbf   : > { %648 = vrot.lane.b32.xlu0 %v3719_v19, %s3400_s23 }
  0xc1   : > { %697 = vrot.lane.b32.xlu1 %v5090_v0, %s3401_s30 }
  0xc3   : > { %695 = vrot.lane.b32.xlu0 %v3719_v19, %s3401_s30 }
  0xc5   : > { %744 = vrot.lane.b32.xlu1 %v5090_v0, %s3402_s21 }
  0xc7   : > { %742 = vrot.lane.b32.xlu0 %v3719_v19, %s3402_s21 }
  0xc9   : > { %791 = vrot.lane.b32.xlu1 %v5090_v0, %s3403_s28 }
  0xcb   : > { %789 = vrot.lane.b32.xlu0 %v3719_v19, %s3403_s28 }
  0xcd   : > { %878 = vperm.xlu1 %3246, %v870_v38  }
  0xcf   : > { %v439_v20 = vpop.permute.xlu1 %438  ;;  %873 = vperm.xlu0 %3245, %v869_v39  }
  0xd1   : > { %v441_v23 = vpop.permute.xlu0 %440  ;;  %1104 = vrot.lane.b32.xlu1 %v5090_v0, %s3396_s27 }
  0xd2   : > { %v3768_v27 = vsel %vm452_vm1, %v439_v20, %v441_v23  ;;  %v3891_v20 = vld [vmem:[%s5072_s2] ss:$8 sps:$4 sm:$0xff]  }
  0xd3   : > { %v486_v21 = vpop.permute.xlu1 %485  ;;  %1150 = vrot.lane.b32.xlu0 %v5090_v0, %s3397_s24 }
  0xd5   : > { %v443_v25 = vpop.permute.xlu0 %442  ;;  %1196 = vrot.lane.b32.xlu1 %v5090_v0, %s3398_s12 }
  0xd6   : > { %v3764_v26 = vsel %vm452_vm1, %v441_v23, %v443_v25 }
  0xd7   : > { %v488_v22 = vpop.permute.xlu1 %487  ;;  %894 = vmatprep.subr.bf16.mxu0 %v3764_v26  ;;  %1242 = vrot.lane.b32.xlu0 %v5090_v0, %s3399_s26 }
  0xd8   : > { %895 = vmatpush1.bf16.msra.mxu0 %v3768_v27  ;;  %v3776_v31 = vsel %vm499_vm2, %v486_v21, %v488_v22 }
  0xd9   : > { %v490_v29 = vpop.permute.xlu0 %489 }
  0xda   : > { %v3772_v30 = vsel %vm499_vm2, %v488_v22, %v490_v29 }
  0xdb   : > { %v3761_v24 = vpop.permute.xlu1 %536  ;;  %896 = vmatprep.subr.bf16.mxu0 %v3772_v30 }
  0xdc   : > { %897 = vmatpush1.bf16.msra.mxu0 %v3776_v31 }
  0xdd   : > { %v535_v33 = vpop.permute.xlu0 %534 }
  0xde   : > { %v3781_v34 = vsel %vm546_vm3, %v535_v33, %v3761_v24 }
  0xdf   : > { %v582_v28 = vpop.permute.xlu1 %581  ;;  %898 = vmatprep.subr.bf16.mxu0 %v3781_v34 }
  0xe1   : > { %v533_v36 = vpop.permute.xlu0 %532 }
  0xe2   : > { %v3787_v37 = vsel %vm546_vm3, %v533_v36, %v535_v33 }
  0xe3   : > { %v580_v32 = vpop.permute.xlu1 %579  ;;  %899 = vmatpush1.bf16.msra.mxu0 %v3787_v37 }
  0xe4   : > { %v3806_v43 = vsel %vm593_vm4, %v580_v32, %v582_v28 }
  0xe5   : > { %v3798_v41 = vpop.permute.xlu0 %583 }
  0xe6   : > { %v3802_v42 = vsel %vm593_vm4, %v582_v28, %v3798_v41 }
  0xe7   : > { %v3784_v35 = vpop.permute.xlu1 %642  ;;  %900 = vmatprep.subr.bf16.mxu0 %v3802_v42 }
  0xe8   : > { %901 = vmatpush1.bf16.msra.mxu0 %v3806_v43 }
  0xe9   : > { %v641_v45 = vpop.permute.xlu0 %640  ;;  %902 = vmatprep.subr.bf16.mxu0 %v3630_v6 }
  0xea   : > { %v3817_v46 = vsel %vm652_vm5, %v641_v45, %v3784_v35 }
  0xeb   : > { %v3796_v40 = vpop.permute.xlu1 %446 }
  0xec   : > { %903 = vmatpush1.bf16.msra.mxu0 %v3623_v4 }
  0xed   : > { %904 = vmatprep.subr.bf16.mxu0 %v3817_v46  ;;  %v445_v48 = vpop.permute.xlu0 %444 }
  0xee   : > { %v3824_v49 = vsel %vm452_vm1, %v445_v48, %v3796_v40  ;;  %v3827_v50 = vsel %vm452_vm1, %v443_v25, %v445_v48 }
  0xef   : > { %v688_v44 = vpop.permute.xlu1 %687  ;;  %5185 = vst [vmem:[#allocation21_spill] sm:$0xff] %v3824_v49  ;;  %5186 = vst [vmem:[#allocation22_spill] sm:$0xff] %v3827_v50  ;;  %937 = vmatprep.subr.bf16.mxu1 %v3824_v49 }
  0xf0   : > { %938 = vmatpush1.bf16.msra.mxu1 %v3827_v50 }
  0xf1   : > { %v639_v52 = vpop.permute.xlu0 %638 }
  0xf2   : > { %v3834_v53 = vsel %vm652_vm5, %v639_v52, %v641_v45 }
  0xf3   : > { %v492_v47 = vpop.permute.xlu1 %491  ;;  %905 = vmatpush1.bf16.msra.mxu0 %v3834_v53 }
  0xf4   : > { %v3857_v61 = vsel %vm499_vm2, %v490_v29, %v492_v47 }
  0xf5   : > { %v690_v55 = vpop.permute.xlu0 %689  ;;  %5188 = vst [vmem:[#allocation24_spill] sm:$0xff] %v3857_v61 }
  0xf6   : > { %v3840_v56 = vsel %vm699_vm6, %v688_v44, %v690_v55 }
  0xf7   : > { %v686_v51 = vpop.permute.xlu1 %685  ;;  %906 = vmatprep.subr.bf16.mxu0 %v3840_v56 }
  0xf8   : > { %v3844_v57 = vsel %vm699_vm6, %v686_v51, %v688_v44 }
  0xf9   : > { %907 = vmatpush1.bf16.msra.mxu0 %v3844_v57  ;;  %v3849_v59 = vpop.permute.xlu0 %493 }
  0xfa   : > { %v3853_v60 = vsel %vm499_vm2, %v492_v47, %v3849_v59 }
  0xfb   : > { %v3837_v54 = vpop.permute.xlu1 %736  ;;  %5187 = vst [vmem:[#allocation23_spill] sm:$0xff] %v3853_v60  ;;  %939 = vmatprep.subr.bf16.mxu1 %v3853_v60 }
  0xfc   : > { %940 = vmatpush1.bf16.msra.mxu1 %v3857_v61 }
  0xfd   : > { %v735_v63 = vpop.permute.xlu0 %734 }
  0xfe   : > { %v3862_v1 = vsel %vm746_vm7, %v735_v63, %v3837_v54 }
  0xff   : > { %v3847_v58 = vpop.permute.xlu1 %540  ;;  %908 = vmatprep.subr.bf16.mxu0 %v3862_v1 }
 0x101   : > { %v539_v3 = vpop.permute.xlu0 %538 }
 0x102   : > { %v3867_v5 = vsel %vm546_vm3, %v539_v3, %v3847_v58  ;;  %v3871_v7 = vsel %vm546_vm3, %v3761_v24, %v539_v3 }
 0x103   : > { %v782_v62 = vpop.permute.xlu1 %781  ;;  %5189 = vst [vmem:[#allocation25_spill] sm:$0xff] %v3867_v5  ;;  %5190 = vst [vmem:[#allocation26_spill] sm:$0xff] %v3871_v7  ;;  %941 = vmatprep.subr.bf16.mxu1 %v3867_v5 }
 0x104   : > { %942 = vmatpush1.bf16.msra.mxu1 %v3871_v7 }
 0x105   : > { %v733_v10 = vpop.permute.xlu0 %732 }
 0x106   : > { %v3876_v11 = vsel %vm746_vm7, %v733_v10, %v735_v63 }
 0x107   : > { %v586_v2 = vpop.permute.xlu1 %585  ;;  %909 = vmatpush1.bf16.msra.mxu0 %v3876_v11 }
 0x108   : > { %v3903_v24 = vsel %vm593_vm4, %v3798_v41, %v586_v2 }
 0x109   : > { %v784_v14 = vpop.permute.xlu0 %783  ;;  %5192 = vst [vmem:[#allocation28_spill] sm:$0xff] %v3903_v24 }
 0x10a   : > { %v3882_v17 = vsel %vm793_vm8, %v782_v62, %v784_v14 }
 0x10b   : > { %v780_v8 = vpop.permute.xlu1 %779  ;;  %910 = vmatprep.subr.bf16.mxu0 %v3882_v17 }
 0x10c   : > { %v3886_v18 = vsel %vm793_vm8, %v780_v8, %v782_v62 }
 0x10d   : > { %911 = vmatpush1.bf16.msra.mxu0 %v3886_v18  ;;  %v588_v21 = vpop.permute.xlu0 %587 }
 0x10e   : > { %v3897_v23 = vsel %vm593_vm4, %v586_v2, %v588_v21 }
 0x10f   : > { %v3879_v15 = vpop.permute.xlu1 %646  ;;  %5191 = vst [vmem:[#allocation27_spill] sm:$0xff] %v3897_v23  ;;  %943 = vmatprep.subr.bf16.mxu1 %v3897_v23 }
 0x110   : > { %927 = vmatmul.mubr.bf16.vlgmr.msra.gmra.mrb[0].mxu0 %v3891_v20  ;;  %944 = vmatpush1.bf16.msra.mxu1 %v3903_v24 }
 0x111   : > { %3102 = vmatprep.mubr.msk.bf16.mxu0 %vm890_vm0, %v3687_v13  ;;  %v645_v25 = vpop.permute.xlu0 %644  ;;  %945 = vmatprep.subr.bf16.mxu1 %v3654_v12 }
 0x112   : > { %v3914_v29 = vsel %vm652_vm5, %v645_v25, %v3879_v15  ;;  %v3919_v36 = vsel %vm652_vm5, %v3784_v35, %v645_v25 }
 0x113   : > { %v3894_v22 = vpop.permute.xlu1 %693  ;;  %5193 = vst [vmem:[#allocation29_spill] sm:$0xff] %v3914_v29  ;;  %5194 = vst [vmem:[#allocation30_spill] sm:$0xff] %v3919_v36 }
 0x114   : > { %946 = vmatpush1.bf16.msra.mxu1 %v3646_v9 }
 0x115   : > { %947 = vmatprep.subr.bf16.mxu1 %v3914_v29  ;;  %v692_v32 = vpop.permute.xlu0 %691 }
 0x116   : > { %v3924_v13 = vsel %vm699_vm6, %v692_v32, %v3894_v22  ;;  %v3930_v41 = vsel %vm699_vm6, %v690_v55, %v692_v32 }
 0x117   : > { %v3909_v28 = vpop.permute.xlu1 %740  ;;  %5195 = vst [vmem:[#allocation31_spill] sm:$0xff] %v3924_v13  ;;  %5196 = vst [vmem:[#allocation32_spill] sm:$0xff] %v3930_v41 }
 0x118   : > { %948 = vmatpush1.bf16.msra.mxu1 %v3919_v36 }
 0x119   : > { %949 = vmatprep.subr.bf16.mxu1 %v3924_v13  ;;  %v739_v38 = vpop.permute.xlu0 %738 }
 0x11a   : > { %v3935_v35 = vsel %vm746_vm7, %v739_v38, %v3909_v28  ;;  %v3948_v51 = vsel %vm746_vm7, %v3837_v54, %v739_v38 }
 0x11b   : > { %v451_v33 = vpop.permute.xlu1 %450  ;;  %5197 = vst [vmem:[#allocation33_spill] sm:$0xff] %v3935_v35  ;;  %5198 = vst [vmem:[#allocation34_spill] sm:$0xff] %v3948_v51 }
 0x11c   : > { %950 = vmatpush1.bf16.msra.mxu1 %v3930_v41 }
 0x11d   : > { %951 = vmatprep.subr.bf16.mxu1 %v3935_v35  ;;  %v449_v44 = vpop.permute.xlu0 %448 }
 0x11e   : > { %v3939_v47 = vsel %vm452_vm1, %v449_v44, %v451_v33  ;;  %v3943_v48 = vsel %vm452_vm1, %v3796_v40, %v449_v44 }
 0x11f   : > { %v3927_v39 = vpop.permute.xlu1 %787  ;;  %980 = vmatprep.subr.bf16.mxu0 %v3939_v47 }
 0x120   : > { %952 = vmatpush1.bf16.msra.mxu1 %v3948_v51  ;;  %981 = vmatpush1.bf16.msra.mxu0 %v3943_v48 }
 0x121   : > { %v786_v52 = vpop.permute.xlu0 %785 }
 0x122   : > { %v3954_v62 = vsel %vm793_vm8, %v786_v52, %v3927_v39  ;;  %v3957_v63 = vsel %vm793_vm8, %v784_v14, %v786_v52 }
 0x123   : > { %v498_v45 = vpop.permute.xlu1 %497  ;;  %5199 = vst [vmem:[#allocation35_spill] sm:$0xff] %v3954_v62  ;;  %5200 = vst [vmem:[#allocation36_spill] sm:$0xff] %v3957_v63  ;;  %953 = vmatprep.subr.bf16.mxu1 %v3954_v62 }
 0x124   : > { %954 = vmatpush1.bf16.msra.mxu1 %v3957_v63 }
 0x125   : > { %1613 = vmatprep.subr.bf16.mxu1 %v3764_v26  ;;  %v496_v40 = vpop.permute.xlu0 %495 }
 0x126   : > { %v3963_v2 = vsel %vm499_vm2, %v496_v40, %v498_v45  ;;  %v3967_v3 = vsel %vm499_vm2, %v3849_v59, %v496_v40 }
 0x127   : > { %v545_v55 = vpop.permute.xlu1 %544  ;;  %970 = vmatmul.mubr.bf16.vlgmr.msra.gmra.mrb[0].mxu1 %v3891_v20  ;;  %982 = vmatprep.subr.bf16.mxu0 %v3963_v2 }
 0x128   : > { %983 = vmatpush1.bf16.msra.mxu0 %v3967_v3  ;;  %1614 = vmatpush1.bf16.msra.mxu1 %v3768_v27 }
 0x129   : > { %1615 = vmatprep.subr.bf16.mxu1 %v3772_v30  ;;  %v543_v8 = vpop.permute.xlu0 %542 }
 0x12a   : > { %v3975_v14 = vsel %vm546_vm3, %v543_v8, %v545_v55  ;;  %v3979_v25 = vsel %vm546_vm3, %v3847_v58, %v543_v8 }
 0x12b   : > { %v592_v54 = vpop.permute.xlu1 %591  ;;  %984 = vmatprep.subr.bf16.mxu0 %v3975_v14 }
 0x12c   : > { %985 = vmatpush1.bf16.msra.mxu0 %v3979_v25  ;;  %1616 = vmatpush1.bf16.msra.mxu1 %v3776_v31 }
 0x12d   : > { %1617 = vmatprep.subr.bf16.mxu1 %v3781_v34  ;;  %v590_v59 = vpop.permute.xlu0 %589 }
 0x12e   : > { %v3986_v32 = vsel %vm593_vm4, %v590_v59, %v592_v54  ;;  %v3989_v33 = vsel %vm593_vm4, %v588_v21, %v590_v59 }
 0x12f   : > { %v651_v10 = vpop.permute.xlu1 %650  ;;  %986 = vmatprep.subr.bf16.mxu0 %v3986_v32 }
 0x130   : > { %987 = vmatpush1.bf16.msra.mxu0 %v3989_v33  ;;  %1618 = vmatpush1.bf16.msra.mxu1 %v3787_v37 }
 0x131   : > { %1619 = vmatprep.subr.bf16.mxu1 %v3802_v42  ;;  %v649_v58 = vpop.permute.xlu0 %648  ;;  %988 = vmatprep.subr.bf16.mxu0 %v3719_v19 }
 0x132   : > { %v3997_v44 = vsel %vm652_vm5, %v649_v58, %v651_v10  ;;  %v4008_v55 = vsel %vm652_vm5, %v3879_v15, %v649_v58  ;;  %v812_v58 = vld [vmem:[#allocation7] sm:$0x3f] }
 0x133   : > { %v698_v38 = vpop.permute.xlu1 %697 }
 0x134   : > { %989 = vmatpush1.bf16.msra.mxu0 %v3703_v16  ;;  %1620 = vmatpush1.bf16.msra.mxu1 %v3806_v43 }
 0x135   : > { %v696_v21 = vpop.permute.xlu0 %695  ;;  %990 = vmatprep.subr.bf16.mxu0 %v3997_v44  ;;  %1621 = vmatprep.subr.bf16.mxu1 %v3630_v6 }
 0x136   : > { %v4004_v52 = vsel %vm699_vm6, %v696_v21, %v698_v38  ;;  %v4019_v8 = vsel %vm699_vm6, %v3894_v22, %v696_v21 }
 0x137   : > { %v745_v45 = vpop.permute.xlu1 %744 }
 0x138   : > { %991 = vmatpush1.bf16.msra.mxu0 %v4008_v55  ;;  %1622 = vmatpush1.bf16.msra.mxu1 %v3623_v4 }
 0x139   : > { %1623 = vmatprep.subr.bf16.mxu1 %v3817_v46  ;;  %v743_v40 = vpop.permute.xlu0 %742  ;;  %992 = vmatprep.subr.bf16.mxu0 %v4004_v52 }
 0x13a   : > { %v4015_v54 = vsel %vm746_vm7, %v743_v40, %v745_v45  ;;  %v4030_v38 = vsel %vm746_vm7, %v3909_v28, %v743_v40 }
 0x13b   : > { %v792_v10 = vpop.permute.xlu1 %791 }
 0x13c   : > { %993 = vmatpush1.bf16.msra.mxu0 %v4019_v8  ;;  %1624 = vmatpush1.bf16.msra.mxu1 %v3834_v53 }
 0x13d   : > { %1625 = vmatprep.subr.bf16.mxu1 %v3840_v56  ;;  %v790_v15 = vpop.permute.xlu0 %789  ;;  %994 = vmatprep.subr.bf16.mxu0 %v4015_v54 }
 0x13e   : > { %v4026_v59 = vsel %vm793_vm8, %v790_v15, %v792_v10  ;;  %v4038_v22 = vsel %vm793_vm8, %v3927_v39, %v790_v15 }
 0x140   : > { %995 = vmatpush1.bf16.msra.mxu0 %v4030_v38  ;;  %1626 = vmatpush1.bf16.msra.mxu1 %v3844_v57 }
 0x141   : > { %1627 = vmatprep.subr.bf16.mxu1 %v3862_v1  ;;  %996 = vmatprep.subr.bf16.mxu0 %v4026_v59 }
 0x144   : > { %997 = vmatpush1.bf16.msra.mxu0 %v4038_v22  ;;  %1628 = vmatpush1.bf16.msra.mxu1 %v3876_v11 }
 0x145   : > { %1629 = vmatprep.subr.bf16.mxu1 %v3882_v17  ;;  %1699 = vmatprep.subr.bf16.mxu0 %v3824_v49 }
 0x147   : > { %1013 = vmatmul.mubr.bf16.vlgmr.msra.gmra.mrb[4].mxu0 %v3891_v20  ;;  %v1036_v20 = vlaneseq }
 0x148   : > { %1630 = vmatpush1.bf16.msra.mxu1 %v3886_v18  ;;  %1700 = vmatpush1.bf16.msra.mxu0 %v3827_v50 }
 0x149   : > { %1701 = vmatprep.subr.bf16.mxu0 %v3853_v60  ;;  %v1037_v28 = vshrl.u32 %v1036_v20, 7 }
 0x14b   : > { %v1054_v39 = vsub.s32 4, %v1037_v28  ;;  %v1058_v21 = vsub.s32 5, %v1037_v28  ;;  %v1038_v10 = vsub.s32 0, %v1037_v28  ;;  %v1042_v0 = vsub.s32 1, %v1037_v28 }
 0x14c   : > { %1702 = vmatpush1.bf16.msra.mxu0 %v3857_v61 }
 0x14d   : > { %1703 = vmatprep.subr.bf16.mxu0 %v3867_v5  ;;  %v4063_v45 = vrot.slane %v812_v58, %v1054_v39  ;;  %v4065_v40 = vrot.slane %v812_v58, %v1058_v21 }
 0x14e   : > { %v4067_v15 = vpop.permute.xlu0 %873 }
 0x14f   : > { %5201 = vst [vmem:[#allocation37_spill] sm:$0xff] %v4063_v45  ;;  %5202 = vst [vmem:[#allocation38_spill] sm:$0xff] %v4065_v40 }
 0x150   : > { %1704 = vmatpush1.bf16.msra.mxu0 %v3871_v7 }
 0x151   : > { %1705 = vmatprep.subr.bf16.mxu0 %v3897_v23 }
 0x154   : > { %1706 = vmatpush1.bf16.msra.mxu0 %v3903_v24 }
 0x155   : > { %1707 = vmatprep.subr.bf16.mxu0 %v3654_v12 }
 0x158   : > { %1708 = vmatpush1.bf16.msra.mxu0 %v3646_v9 }
 0x159   : > { %1709 = vmatprep.subr.bf16.mxu0 %v3914_v29 }
 0x15c   : > { %1710 = vmatpush1.bf16.msra.mxu0 %v3919_v36  ;;  %v4075_v36 = vrot.slane %v812_v58, %v1042_v0 }
 0x15d   : > { %1711 = vmatprep.subr.bf16.mxu0 %v3924_v13 }
 0x15e   : > { %5204 = vst [vmem:[#allocation40_spill] sm:$0xff] %v4075_v36 }
 0x160   : > { %1712 = vmatpush1.bf16.msra.mxu0 %v3930_v41  ;;  %v4069_v41 = vpop.permute.xlu1 %878 }
 0x161   : > { %1713 = vmatprep.subr.bf16.mxu0 %v3935_v35 }
 0x164   : > { %1714 = vmatpush1.bf16.msra.mxu0 %v3948_v51 }
 0x165   : > { %1715 = vmatprep.subr.bf16.mxu0 %v3954_v62  ;;  %v4071_v62 = vrot.slane %v812_v58, %v1038_v10 }
 0x167   : > { %5203 = vst [vmem:[#allocation39_spill] sm:$0xff] %v4071_v62 }
 0x168   : > { %1716 = vmatpush1.bf16.msra.mxu0 %v3957_v63 }
 0x1e3   : > { %v928_v35 = vpop.f32.mrb[0].mxu0 }
 0x1e4   : > { %v930_v51 = vpop.f32.mrb[1].mxu0  ;;  %v929_v63 = vadd.f32 %v928_v35, %v4067_v15 }
 0x1e5   : > { %v932_v20 = vpop.f32.mrb[2].mxu0  ;;  %v931_v13 = vadd.f32 %v930_v51, %v4067_v15 }
 0x1e6   : > { %v933_v39 = vadd.f32 %v932_v20, %v4069_v41  ;;  %v1023_v21 = vmax.f32 %v929_v63, 0.0  ;;  %v934_v29 = vpop.f32.mrb[3].mxu0 }
 0x1e7   : > { %v935_v9 = vadd.f32 %v934_v29, %v4069_v41  ;;  %v1024_v12 = vmax.f32 %v931_v13, 0.0 }
 0x1e8   : > { %v1029_v24 = vmax.f32 %v933_v39, 0.0  ;;  %v1066_v23 = vmul.f32 %v4071_v62, %v1023_v21 }
 0x1e9   : > { %v1030_v7 = vmax.f32 %v935_v9, 0.0  ;;  %v1067_v10 = vmul.f32 %v4075_v36, %v1024_v12  ;;  %v1046_v9 = vsub.s32 2, %v1037_v28 }
 0x1ea   : > { %v1072_v35 = vmul.f32 %v4071_v62, %v1029_v24 }
 0x1eb   : > { %v1073_v5 = vmul.f32 %v4075_v36, %v1030_v7  ;;  %v4103_v63 = vrot.slane %v812_v58, %v1046_v9 }
 0x1ec   : > { %v4083_v51 = vpack.c.bf16 %v1072_v35, %v1066_v23 }
 0x1ed   : > { %v4085_v0 = vpack.c.bf16 %v1073_v5, %v1067_v10  ;;  %v1050_v5 = vsub.s32 3, %v1037_v28  ;;  %5207 = vst [vmem:[#allocation43_spill] sm:$0xff] %v4103_v63 }
 0x1ee   : > { %5205 = vst [vmem:[#allocation41_spill] sm:$0xff] %v4083_v51  ;;  %1152 = vrot.lane.b32.xlu0 %v4083_v51, %s3397_s24  ;;  %1106 = vrot.lane.b32.xlu1 %v4083_v51, %s3396_s27 }
 0x1ef   : > { %5206 = vst [vmem:[#allocation42_spill] sm:$0xff] %v4085_v0  ;;  %v4106_v10 = vrot.slane %v812_v58, %v1050_v5 }
 0x1f1   : > { %5208 = vst [vmem:[#allocation44_spill] sm:$0xff] %v4106_v10 }
 0x1f2   : > { %1244 = vrot.lane.b32.xlu0 %v4083_v51, %s3399_s26  ;;  %1198 = vrot.lane.b32.xlu1 %v4083_v51, %s3398_s12 }
 0x1f6   : > { %1108 = vrot.lane.b32.xlu0 %v4085_v0, %s3396_s27  ;;  %1300 = vrot.lane.b32.xlu1 %v4083_v51, %s3400_s23 }
 0x1fa   : > { %1154 = vrot.lane.b32.xlu1 %v4085_v0, %s3397_s24  ;;  %v971_v12 = vpop.f32.mrb[0].mxu1 }
 0x1fb   : > { %v972_v7 = vadd.f32 %v971_v12, %v4067_v15  ;;  %v973_v23 = vpop.f32.mrb[1].mxu1 }
 0x1fc   : > { %v974_v24 = vadd.f32 %v973_v23, %v4067_v15  ;;  %v975_v29 = vpop.f32.mrb[2].mxu1 }
 0x1fd   : > { %v1025_v13 = vmax.f32 %v972_v7, 0.0  ;;  %v976_v20 = vadd.f32 %v975_v29, %v4069_v41  ;;  %v977_v39 = vpop.f32.mrb[3].mxu1 }
 0x1fe   : > { %v1026_v21 = vmax.f32 %v974_v24, 0.0  ;;  %v978_v35 = vadd.f32 %v977_v39, %v4069_v41 }
 0x1ff   : > { %v1031_v36 = vmax.f32 %v976_v20, 0.0  ;;  %v1068_v28 = vmul.f32 %v4103_v63, %v1025_v13 }
 0x200   : > { %v1032_v62 = vmax.f32 %v978_v35, 0.0  ;;  %v1069_v23 = vmul.f32 %v4106_v10, %v1026_v21 }
 0x201   : > { %v1074_v12 = vmul.f32 %v4103_v63, %v1031_v36  ;;  %v4132_v36 = vld [vmem:[%s5074_s4 + $0x4] ss:$12 sps:$4 sm:$0xff]  }
 0x202   : > { %v1075_v7 = vmul.f32 %v4106_v10, %v1032_v62  ;;  %1645 = vmatprep.mubr.bf16.mxu1 %v4132_v36  ;;  %1731 = vmatprep.mubr.bf16.mxu0 %v4132_v36 }
 0x203   : > { %v4113_v9 = vpack.c.bf16 %v1074_v12, %v1068_v28 }
 0x204   : > { %v4115_v61 = vpack.c.bf16 %v1075_v7, %v1069_v23 }
 0x205   : > { %5209 = vst [vmem:[#allocation45_spill] sm:$0xff] %v4113_v9  ;;  %1304 = vrot.lane.b32.xlu0 %v4113_v9, %s3400_s23  ;;  %1350 = vrot.lane.b32.xlu1 %v4113_v9, %s3401_s30 }
 0x206   : > { %5210 = vst [vmem:[#allocation46_spill] sm:$0xff] %v4115_v61 }
 0x209   : > { %1200 = vrot.lane.b32.xlu0 %v4085_v0, %s3398_s12  ;;  %1246 = vrot.lane.b32.xlu1 %v4085_v0, %s3399_s26 }
 0x20d   : > { %1346 = vrot.lane.b32.xlu0 %v4083_v51, %s3401_s30  ;;  %1110 = vrot.lane.b32.xlu1 %v4113_v9, %s3396_s27 }
 0x211   : > { %1396 = vrot.lane.b32.xlu0 %v4113_v9, %s3402_s21  ;;  %1302 = vrot.lane.b32.xlu1 %v4085_v0, %s3400_s23 }
 0x215   : > { %1156 = vrot.lane.b32.xlu0 %v4113_v9, %s3397_s24  ;;  %1392 = vrot.lane.b32.xlu1 %v4083_v51, %s3402_s21 }
 0x219   : > { %1348 = vrot.lane.b32.xlu0 %v4085_v0, %s3401_s30  ;;  %1442 = vrot.lane.b32.xlu1 %v4113_v9, %s3403_s28 }
 0x21a   : > { %v1014_v62 = vpop.f32.mrb[4].mxu0 }
 0x21b   : > { %v1015_v58 = vadd.f32 %v1014_v62, %v4067_v15  ;;  %v1016_v5 = vpop.f32.mrb[5].mxu0 }
 0x21c   : > { %v1017_v24 = vadd.f32 %v1016_v5, %v4067_v15  ;;  %v1018_v29 = vpop.f32.mrb[6].mxu0 }
 0x21d   : > { %v1027_v13 = vmax.f32 %v1015_v58, 0.0  ;;  %v1019_v20 = vadd.f32 %v1018_v29, %v4069_v41  ;;  %v1020_v39 = vpop.f32.mrb[7].mxu0  ;;  %1438 = vrot.lane.b32.xlu0 %v4083_v51, %s3403_s28  ;;  %1394 = vrot.lane.b32.xlu1 %v4085_v0, %s3402_s21  ;;  %v1151_v29 = vpop.permute.xlu0 %1150 }
 0x21e   : > { %v1028_v21 = vmax.f32 %v1017_v24, 0.0  ;;  %v1021_v35 = vadd.f32 %v1020_v39, %v4069_v41  ;;  %v5213_v41 = vmov 0   ;;  %v1105_v24 = vpop.permute.xlu1 %1104  ;;  %v1582_v39 = vld [vmem:[%s5075_s5] sm:$0xff] }
 0x21f   : > { %v1033_v28 = vmax.f32 %v1019_v20, 0.0  ;;  %v1070_v23 = vmul.f32 %v4063_v45, %v1027_v13 }
 0x220   : > { %v1034_v12 = vmax.f32 %v1021_v35, 0.0  ;;  %v1071_v7 = vmul.f32 %v4065_v40, %v1028_v21  ;;  %v1583_v21 = vld [vmem:[%s5075_s5 + $0x8] sm:$0xff] }
 0x221   : > { %v1076_v15 = vmul.f32 %v4063_v45, %v1033_v28  ;;  %1112 = vrot.lane.b32.xlu0 %v4115_v61, %s3396_s27  ;;  %1158 = vrot.lane.b32.xlu1 %v4115_v61, %s3397_s24  ;;  %v1243_v20 = vpop.permute.xlu0 %1242 }
 0x222   : > { %v1077_v62 = vmul.f32 %v4065_v40, %v1034_v12  ;;  %v1197_v13 = vpop.permute.xlu1 %1196 }
 0x223   : > { %v4164_v58 = vpack.c.bf16 %v1076_v15, %v1070_v23 }
 0x224   : > { %v4166_v5 = vpack.c.bf16 %v1077_v62, %v1071_v7 }
 0x225   : > { %5211 = vst [vmem:[#allocation47_spill] sm:$0xff] %v4164_v58  ;;  %1440 = vrot.lane.b32.xlu0 %v4085_v0, %s3403_s28  ;;  %1202 = vrot.lane.b32.xlu1 %v4113_v9, %s3398_s12 }
 0x226   : > { %5212 = vst [vmem:[#allocation48_spill] sm:$0xff] %v4166_v5 }
 0x229   : > { %1204 = vrot.lane.b32.xlu0 %v4115_v61, %s3398_s12  ;;  %1248 = vrot.lane.b32.xlu1 %v4113_v9, %s3399_s26 }
 0x22d   : > { %1250 = vrot.lane.b32.xlu0 %v4115_v61, %s3399_s26  ;;  %1306 = vrot.lane.b32.xlu1 %v4115_v61, %s3400_s23 }
 0x231   : > { %1308 = vrot.lane.b32.xlu0 %v4164_v58, %s3400_s23  ;;  %1398 = vrot.lane.b32.xlu1 %v4115_v61, %s3402_s21 }
 0x235   : > { %1400 = vrot.lane.b32.xlu0 %v4164_v58, %s3402_s21  ;;  %1352 = vrot.lane.b32.xlu1 %v4115_v61, %s3401_s30 }
 0x239   : > { %1354 = vrot.lane.b32.xlu0 %v4164_v58, %s3401_s30  ;;  %1444 = vrot.lane.b32.xlu1 %v4115_v61, %s3403_s28 }
 0x23d   : > { %1446 = vrot.lane.b32.xlu0 %v4164_v58, %s3403_s28  ;;  %1114 = vrot.lane.b32.xlu1 %v4164_v58, %s3396_s27 }
 0x241   : > { %1116 = vrot.lane.b32.xlu0 %v4166_v5, %s3396_s27  ;;  %1160 = vrot.lane.b32.xlu1 %v4164_v58, %s3397_s24 }
 0x245   : > { %1162 = vrot.lane.b32.xlu0 %v4166_v5, %s3397_s24  ;;  %1206 = vrot.lane.b32.xlu1 %v4164_v58, %s3398_s12 }
 0x249   : > { %1208 = vrot.lane.b32.xlu0 %v4166_v5, %s3398_s12  ;;  %1252 = vrot.lane.b32.xlu1 %v4164_v58, %s3399_s26 }
 0x24d   : > { %1254 = vrot.lane.b32.xlu0 %v4166_v5, %s3399_s26  ;;  %1310 = vrot.lane.b32.xlu1 %v4166_v5, %s3400_s23 }
 0x251   : > { %1312 = vrot.lane.b32.xlu0 %v5213_v41, %s3400_s23  ;;  %1356 = vrot.lane.b32.xlu1 %v4166_v5, %s3401_s30 }
 0x255   : > { %1358 = vrot.lane.b32.xlu0 %v5213_v41, %s3401_s30  ;;  %1402 = vrot.lane.b32.xlu1 %v4166_v5, %s3402_s21 }
 0x259   : > { %1404 = vrot.lane.b32.xlu0 %v5213_v41, %s3402_s21  ;;  %1448 = vrot.lane.b32.xlu1 %v4166_v5, %s3403_s28 }
 0x25d   : > { %1450 = vrot.lane.b32.xlu0 %v5213_v41, %s3403_s28  ;;  %1586 = vperm.xlu1 %3246, %v1582_v39  }
 0x260   : > { %v1107_v35 = vpop.permute.xlu1 %1106  ;;  %v1153_v28 = vpop.permute.xlu0 %1152 }
 0x261   : > { %1591 = vperm.xlu0 %3245, %v1583_v21   ;;  %1921 = vrot.lane.b32.xlu1 %v5213_v41, %s3396_s27  ;;  %v4243_v39 = vsel %vm452_vm1, %v1105_v24, %v1107_v35  ;;  %v4251_v45 = vsel %vm499_vm2, %v1151_v29, %v1153_v28 }
 0x262   : > { %5214 = vst [vmem:[#allocation49_spill] sm:$0xff] %v4251_v45 }
 0x264   : > { %v1199_v12 = vpop.permute.xlu1 %1198  ;;  %v1245_v23 = vpop.permute.xlu0 %1244 }
 0x265   : > { %1967 = vrot.lane.b32.xlu0 %v5213_v41, %s3397_s24  ;;  %2013 = vrot.lane.b32.xlu1 %v5213_v41, %s3398_s12  ;;  %v4265_v50 = vsel %vm546_vm3, %v1197_v13, %v1199_v12  ;;  %v4274_v58 = vsel %vm593_vm4, %v1243_v20, %v1245_v23 }
 0x266   : > { %5216 = vst [vmem:[#allocation51_spill] sm:$0xff] %v4265_v50  ;;  %5218 = vst [vmem:[#allocation53_spill] sm:$0xff] %v4274_v58 }
 0x268   : > { %v1301_v15 = vpop.permute.xlu1 %1300  ;;  %v1109_v7 = vpop.permute.xlu0 %1108 }
 0x269   : > { %v4239_v62 = vsel %vm452_vm1, %v1107_v35, %v1109_v7 }
 0x26a   : > { %1631 = vmatprep.subr.bf16.mxu1 %v4239_v62 }
 0x26b   : > { %1632 = vmatpush1.bf16.msra.mxu1 %v4243_v39 }
 0x26c   : > { %v1155_v21 = vpop.permute.xlu1 %1154 }
 0x26d   : > { %v4247_v40 = vsel %vm499_vm2, %v1153_v28, %v1155_v21 }
 0x26e   : > { %1633 = vmatprep.subr.bf16.mxu1 %v4247_v40 }
 0x26f   : > { %1634 = vmatpush1.bf16.msra.mxu1 %v4251_v45 }
 0x277   : > { %v4254_v10 = vpop.permute.xlu1 %1350  ;;  %v4256_v63 = vpop.permute.xlu0 %1304 }
 0x27b   : > { %v4258_v60 = vpop.permute.xlu1 %1246  ;;  %v1201_v24 = vpop.permute.xlu0 %1200 }
 0x27c   : > { %v4261_v35 = vsel %vm546_vm3, %v1199_v12, %v1201_v24  ;;  %v4270_v29 = vsel %vm593_vm4, %v1245_v23, %v4258_v60 }
 0x27d   : > { %5215 = vst [vmem:[#allocation50_spill] sm:$0xff] %v4261_v35  ;;  %1635 = vmatprep.subr.bf16.mxu1 %v4261_v35  ;;  %5217 = vst [vmem:[#allocation52_spill] sm:$0xff] %v4270_v29 }
 0x27e   : > { %1636 = vmatpush1.bf16.msra.mxu1 %v4265_v50 }
 0x27f   : > { %v1111_v28 = vpop.permute.xlu1 %1110  ;;  %1637 = vmatprep.subr.bf16.mxu1 %v4270_v29  ;;  %v1347_v49 = vpop.permute.xlu0 %1346 }
 0x282   : > { %1638 = vmatpush1.bf16.msra.mxu1 %v4274_v58 }
 0x283   : > { %v1303_v5 = vpop.permute.xlu1 %1302  ;;  %1639 = vmatprep.subr.bf16.mxu1 %v4085_v0  ;;  %v4278_v13 = vpop.permute.xlu0 %1396 }
 0x284   : > { %v4283_v12 = vsel %vm652_vm5, %v1303_v5, %v4256_v63  ;;  %v4287_v20 = vsel %vm652_vm5, %v1301_v15, %v1303_v5 }
 0x285   : > { %5219 = vst [vmem:[#allocation54_spill] sm:$0xff] %v4283_v12  ;;  %5220 = vst [vmem:[#allocation55_spill] sm:$0xff] %v4287_v20 }
 0x286   : > { %1640 = vmatpush1.bf16.msra.mxu1 %v4083_v51 }
 0x287   : > { %v1393_v50 = vpop.permute.xlu1 %1392  ;;  %1641 = vmatprep.subr.bf16.mxu1 %v4283_v12  ;;  %v1157_v29 = vpop.permute.xlu0 %1156  ;;  %v4303_v12 = vld [vmem:[%s5074_s4] ss:$12 sps:$4 sm:$0xff]  }
 0x28a   : > { %1642 = vmatpush1.bf16.msra.mxu1 %v4287_v20 }
 0x28b   : > { %v4290_v23 = vpop.permute.xlu1 %1442  ;;  %v1349_v0 = vpop.permute.xlu0 %1348 }
 0x28c   : > { %v4293_v58 = vsel %vm699_vm6, %v1347_v49, %v1349_v0  ;;  %v4297_v51 = vsel %vm699_vm6, %v1349_v0, %v4254_v10 }
 0x28d   : > { %5221 = vst [vmem:[#allocation56_spill] sm:$0xff] %v4293_v58  ;;  %5222 = vst [vmem:[#allocation57_spill] sm:$0xff] %v4297_v51  ;;  %1643 = vmatprep.subr.bf16.mxu1 %v4297_v51 }
 0x28e   : > { %1644 = vmatpush1.bf16.msra.mxu1 %v4293_v58 }
 0x28f   : > { %v1395_v5 = vpop.permute.xlu1 %1394  ;;  %v1439_v15 = vpop.permute.xlu0 %1438 }
 0x290   : > { %v4307_v20 = vsel %vm746_vm7, %v1393_v50, %v1395_v5  ;;  %v4311_v49 = vsel %vm746_vm7, %v1395_v5, %v4278_v13  ;;  %v4327_v5 = vsel %vm452_vm1, %v1109_v7, %v1111_v28  ;;  %v4344_v7 = vsel %vm499_vm2, %v1155_v21, %v1157_v29 }
 0x291   : > { %5223 = vst [vmem:[#allocation58_spill] sm:$0xff] %v4307_v20  ;;  %5224 = vst [vmem:[#allocation59_spill] sm:$0xff] %v4311_v49  ;;  %1646 = vmatmul.mubr.bf16.vlgmr.msra.gmra.mrb[4].mxu1 %v4303_v12  ;;  %1656 = vmatprep.subr.bf16.mxu1 %v4311_v49 }
 0x292   : > { %1657 = vmatpush1.bf16.msra.mxu1 %v4307_v20  ;;  %1688 = vmatprep.mubr.bf16.mxu1 %v5213_v41  ;;  %5226 = vst [vmem:[#allocation61_spill] sm:$0xff] %v4327_v5  ;;  %5228 = vst [vmem:[#allocation63_spill] sm:$0xff] %v4344_v7 }
 0x293   : > { %v4317_v0 = vpop.permute.xlu1 %1158  ;;  %v4319_v58 = vpop.permute.xlu0 %1112 }
 0x294   : > { %v4323_v50 = vsel %vm452_vm1, %v1111_v28, %v4319_v58  ;;  %v4332_v20 = vsel %vm499_vm2, %v1157_v29, %v4317_v0  ;;  %v4349_v28 = vld [vmem:[%s5074_s4 + $0x8] ss:$12 sps:$4 sm:$0xff]  }
 0x295   : > { %5225 = vst [vmem:[#allocation60_spill] sm:$0xff] %v4323_v50  ;;  %1717 = vmatprep.subr.bf16.mxu0 %v4323_v50  ;;  %5227 = vst [vmem:[#allocation62_spill] sm:$0xff] %v4332_v20 }
 0x296   : > { %1718 = vmatpush1.bf16.msra.mxu0 %v4327_v5 }
 0x297   : > { %v1203_v49 = vpop.permute.xlu1 %1202  ;;  %1719 = vmatprep.subr.bf16.mxu0 %v4332_v20  ;;  %v1441_v51 = vpop.permute.xlu0 %1440 }
 0x298   : > { %v4336_v35 = vsel %vm793_vm8, %v1439_v15, %v1441_v51  ;;  %v4340_v45 = vsel %vm793_vm8, %v1441_v51, %v4290_v23  ;;  %v4360_v21 = vsel %vm546_vm3, %v1201_v24, %v1203_v49 }
 0x299   : > { %1658 = vmatprep.subr.bf16.mxu1 %v4340_v45  ;;  %5230 = vst [vmem:[#allocation65_spill] sm:$0xff] %v4360_v21 }
 0x29a   : > { %1659 = vmatpush1.bf16.msra.mxu1 %v4336_v35  ;;  %1720 = vmatpush1.bf16.msra.mxu0 %v4344_v7 }
 0x29b   : > { %v1249_v15 = vpop.permute.xlu1 %1248  ;;  %v4353_v20 = vpop.permute.xlu0 %1204 }
 0x29c   : > { %v4357_v51 = vsel %vm546_vm3, %v1203_v49, %v4353_v20  ;;  %v4375_v24 = vsel %vm593_vm4, %v4258_v60, %v1249_v15 }
 0x29d   : > { %5229 = vst [vmem:[#allocation64_spill] sm:$0xff] %v4357_v51  ;;  %3106 = vmatmul.mubr.msk.bf16.vlgmr.msra.gmra.mrb[4].mxu1 %vm1609_vm9, %v4349_v28  ;;  %1721 = vmatprep.subr.bf16.mxu0 %v4357_v51  ;;  %5231 = vst [vmem:[#allocation66_spill] sm:$0xff] %v4375_v24 }
 0x29e   : > { %1722 = vmatpush1.bf16.msra.mxu0 %v4360_v21  ;;  %1774 = vmatprep.mubr.bf16.mxu1 %v5213_v41 }
 0x29f   : > { %v1307_v29 = vpop.permute.xlu1 %1306  ;;  %v4367_v7 = vpop.permute.xlu0 %1250 }
 0x2a0   : > { %v4371_v5 = vsel %vm593_vm4, %v1249_v15, %v4367_v7 }
 0x2a1   : > { %1723 = vmatprep.subr.bf16.mxu0 %v4371_v5 }
 0x2a2   : > { %1724 = vmatpush1.bf16.msra.mxu0 %v4375_v24 }
 0x2a3   : > { %v1399_v49 = vpop.permute.xlu1 %1398  ;;  %1725 = vmatprep.subr.bf16.mxu0 %v4115_v61  ;;  %v4380_v21 = vpop.permute.xlu0 %1308  ;;  %v4396_v61 = vsel %vm652_vm5, %v4256_v63, %v1307_v29 }
 0x2a4   : > { %v4385_v51 = vsel %vm652_vm5, %v1307_v29, %v4380_v21 }
 0x2a5   : > { %5232 = vst [vmem:[#allocation67_spill] sm:$0xff] %v4385_v51 }
 0x2a6   : > { %1726 = vmatpush1.bf16.msra.mxu0 %v4113_v9  ;;  %v4400_v9 = vsel %vm746_vm7, %v4278_v13, %v1399_v49 }
 0x2a7   : > { %1727 = vmatprep.subr.bf16.mxu0 %v4385_v51  ;;  %v4388_v50 = vpop.permute.xlu0 %1400  ;;  %v1353_v60 = vpop.permute.xlu1 %1352  ;;  %5233 = vst [vmem:[#allocation68_spill] sm:$0xff] %v4400_v9 }
 0x2a8   : > { %v4392_v15 = vsel %vm746_vm7, %v1399_v49, %v4388_v50  ;;  %v4413_v63 = vsel %vm699_vm6, %v4254_v10, %v1353_v60 }
 0x2a9   : > { %1742 = vmatprep.subr.bf16.mxu1 %v4392_v15 }
 0x2aa   : > { %1728 = vmatpush1.bf16.msra.mxu0 %v4396_v61  ;;  %1743 = vmatpush1.bf16.msra.mxu1 %v4400_v9  ;;  %v4427_v9 = vld [vmem:[%s5076_s6 + $0x4] ss:$16 sps:$4 sm:$0xff]  }
 0x2ab   : > { %v4405_v51 = vpop.permute.xlu0 %1354  ;;  %v1445_v13 = vpop.permute.xlu1 %1444 }
 0x2ac   : > { %v4409_v24 = vsel %vm699_vm6, %v1353_v60, %v4405_v51  ;;  %v4431_v10 = vsel %vm793_vm8, %v4290_v23, %v1445_v13 }
 0x2ad   : > { %1729 = vmatprep.subr.bf16.mxu0 %v4409_v24 }
 0x2ae   : > { %1730 = vmatpush1.bf16.msra.mxu0 %v4413_v63 }
 0x2af   : > { %2488 = vmatprep.subr.bf16.mxu0 %v3764_v26  ;;  %v4418_v29 = vpop.permute.xlu0 %1446 }
 0x2b0   : > { %v4422_v49 = vsel %vm793_vm8, %v1445_v13, %v4418_v29 }
 0x2b1   : > { %1732 = vmatmul.mubr.bf16.vlgmr.msra.gmra.mrb[8].mxu0 %v4303_v12  ;;  %1744 = vmatprep.subr.bf16.mxu1 %v4422_v49 }
 0x2b2   : > { %1745 = vmatpush1.bf16.msra.mxu1 %v4431_v10  ;;  %2489 = vmatpush1.bf16.msra.mxu0 %v3768_v27  ;;  %v1115_v27 = vpop.permute.xlu1 %1114 }
 0x2b3   : > { %1785 = vmatprep.subr.bf16.mxu1 %v3939_v47  ;;  %2490 = vmatprep.subr.bf16.mxu0 %v3772_v30  ;;  %v1117_v26 = vpop.permute.xlu0 %1116 }
 0x2b4   : > { %2520 = vmatprep.mubr.bf16.mxu0 %v4427_v9 }
 0x2b5   : > { %3107 = vmatmul.mubr.msk.bf16.vlgmr.msra.gmra.mrb[8].mxu1 %vm1609_vm9, %v4349_v28 }
 0x2b6   : > { %1786 = vmatpush1.bf16.msra.mxu1 %v3943_v48  ;;  %2491 = vmatpush1.bf16.msra.mxu0 %v3776_v31  ;;  %v1161_v31 = vpop.permute.xlu1 %1160 }
 0x2b7   : > { %1787 = vmatprep.subr.bf16.mxu1 %v3963_v2  ;;  %2492 = vmatprep.subr.bf16.mxu0 %v3781_v34  ;;  %v1163_v30 = vpop.permute.xlu0 %1162 }
 0x2b8   : > { %1817 = vmatprep.mubr.bf16.mxu1 %v4132_v36 }
 0x2ba   : > { %1788 = vmatpush1.bf16.msra.mxu1 %v3967_v3  ;;  %2493 = vmatpush1.bf16.msra.mxu0 %v3787_v37  ;;  %v4478_v37 = vsel %vm452_vm1, %v1115_v27, %v1117_v26  ;;  %v5241_v26 = vld [vmem:[#allocation48_spill] sm:$0xff] }
 0x2bb   : > { %1789 = vmatprep.subr.bf16.mxu1 %v3975_v14  ;;  %2494 = vmatprep.subr.bf16.mxu0 %v3802_v42  ;;  %v1209_v34 = vpop.permute.xlu0 %1208  ;;  %v1207_v42 = vpop.permute.xlu1 %1206 }
 0x2bc   : > { %v4506_v36 = vsel %vm546_vm3, %v4353_v20, %v1207_v42  ;;  %v5240_v20 = vld [vmem:[#allocation41_spill] sm:$0xff] }
 0x2be   : > { %1790 = vmatpush1.bf16.msra.mxu1 %v3979_v25  ;;  %2495 = vmatpush1.bf16.msra.mxu0 %v3806_v43  ;;  %v4484_v43 = vsel %vm452_vm1, %v4319_v58, %v1115_v27  ;;  %v5242_v27 = vld [vmem:[#allocation54_spill] sm:$0xff] }
 0x2bf   : > { %1791 = vmatprep.subr.bf16.mxu1 %v3986_v32  ;;  %2496 = vmatprep.subr.bf16.mxu0 %v3630_v6 }
 0x2c2   : > { %1792 = vmatpush1.bf16.msra.mxu1 %v3989_v33  ;;  %2497 = vmatpush1.bf16.msra.mxu0 %v3623_v4 }
 0x2c3   : > { %2498 = vmatprep.subr.bf16.mxu0 %v3817_v46  ;;  %1793 = vmatprep.subr.bf16.mxu1 %v3719_v19  ;;  %v5234_v46 = vld [vmem:[#allocation49_spill] sm:$0xff] }
 0x2c6   : > { %1794 = vmatpush1.bf16.msra.mxu1 %v3703_v16  ;;  %2499 = vmatpush1.bf16.msra.mxu0 %v3834_v53  ;;  %v4489_v53 = vsel %vm499_vm2, %v1161_v31, %v1163_v30 }
 0x2c7   : > { %1795 = vmatprep.subr.bf16.mxu1 %v3997_v44  ;;  %2500 = vmatprep.subr.bf16.mxu0 %v3840_v56  ;;  %v1255_v56 = vpop.permute.xlu0 %1254 }
 0x2ca   : > { %1796 = vmatpush1.bf16.msra.mxu1 %v4008_v55  ;;  %2501 = vmatpush1.bf16.msra.mxu0 %v3844_v57  ;;  %v5235_v57 = vld [vmem:[#allocation50_spill] sm:$0xff] }
 0x2cb   : > { %1797 = vmatprep.subr.bf16.mxu1 %v4004_v52  ;;  %2502 = vmatprep.subr.bf16.mxu0 %v3862_v1  ;;  %v4495_v1 = vsel %vm499_vm2, %v4317_v0, %v1161_v31  ;;  %v1313_v58 = vpop.permute.xlu0 %1312  ;;  %v5239_v0 = vld [vmem:[#allocation42_spill] sm:$0xff]  ;;  %v5243_v31 = vld [vmem:[#allocation47_spill] sm:$0xff] }
 0x2ce   : > { %1798 = vmatpush1.bf16.msra.mxu1 %v4019_v8  ;;  %2503 = vmatpush1.bf16.msra.mxu0 %v3876_v11  ;;  %v1253_v11 = vpop.permute.xlu1 %1252 }
 0x2cf   : > { %1799 = vmatprep.subr.bf16.mxu1 %v4015_v54  ;;  %2504 = vmatprep.subr.bf16.mxu0 %v3882_v17  ;;  %v5236_v17 = vld [vmem:[#allocation51_spill] sm:$0xff]  ;;  %v4517_v60 = vsel %vm593_vm4, %v4367_v7, %v1253_v11  ;;  %v1359_v13 = vpop.permute.xlu0 %1358  ;;  %v5245_v7 = vld [vmem:[#allocation57_spill] sm:$0xff] }
 0x2d2   : > { %1800 = vmatpush1.bf16.msra.mxu1 %v4030_v38  ;;  %2505 = vmatpush1.bf16.msra.mxu0 %v3886_v18  ;;  %v4500_v18 = vsel %vm546_vm3, %v1207_v42, %v1209_v34  ;;  %v1311_v23 = vpop.permute.xlu1 %1310  ;;  %v5244_v34 = vld [vmem:[#allocation55_spill] sm:$0xff] }
 0x2d3   : > { %1801 = vmatprep.subr.bf16.mxu1 %v4026_v59  ;;  %2506 = vmatprep.subr.bf16.mxu0 %v4239_v62  ;;  %v5238_v62 = vld [vmem:[#allocation53_spill] sm:$0xff]  ;;  %v4526_v42 = vsel %vm652_vm5, %v1311_v23, %v1313_v58  ;;  %v5247_v58 = vld [vmem:[#allocation59_spill] sm:$0xff] }
 0x2d6   : > { %1802 = vmatpush1.bf16.msra.mxu1 %v4038_v22  ;;  %2507 = vmatpush1.bf16.msra.mxu0 %v4243_v39  ;;  %v4511_v39 = vsel %vm593_vm4, %v1253_v11, %v1255_v56  ;;  %v1357_v30 = vpop.permute.xlu1 %1356  ;;  %v1405_v56 = vpop.permute.xlu0 %1404  ;;  %v5246_v11 = vld [vmem:[#allocation56_spill] sm:$0xff] }
 0x2d7   : > { %1803 = vmatprep.subr.bf16.mxu1 %v4478_v37  ;;  %2508 = vmatprep.subr.bf16.mxu0 %v4247_v40  ;;  %v5237_v40 = vld [vmem:[#allocation52_spill] sm:$0xff] }
 0x2da   : > { %1804 = vmatpush1.bf16.msra.mxu1 %v4484_v43  ;;  %2509 = vmatpush1.bf16.msra.mxu0 %v5234_v46  ;;  %v4532_v46 = vsel %vm652_vm5, %v4380_v21, %v1311_v23  ;;  %v4548_v21 = vsel %vm699_vm6, %v4405_v51, %v1357_v30 }
 0x2db   : > { %1805 = vmatprep.subr.bf16.mxu1 %v4489_v53  ;;  %2510 = vmatprep.subr.bf16.mxu0 %v5235_v57  ;;  %v4537_v57 = vld [vmem:[%s5076_s6] ss:$16 sps:$4 sm:$0xff]  }
 0x2de   : > { %1806 = vmatpush1.bf16.msra.mxu1 %v4495_v1  ;;  %2511 = vmatpush1.bf16.msra.mxu0 %v5236_v17  ;;  %v4542_v17 = vsel %vm699_vm6, %v1357_v30, %v1359_v13  ;;  %v1451_v13 = vpop.permute.xlu0 %1450 }
 0x2df   : > { %1807 = vmatprep.subr.bf16.mxu1 %v4500_v18  ;;  %2512 = vmatprep.subr.bf16.mxu0 %v5237_v40  ;;  %v1403_v40 = vpop.permute.xlu1 %1402 }
 0x2e0   : > { %v4554_v23 = vsel %vm746_vm7, %v1403_v40, %v1405_v56  ;;  %v5254_v56 = vld [vmem:[#allocation26_spill] sm:$0xff] }
 0x2e2   : > { %1808 = vmatpush1.bf16.msra.mxu1 %v4506_v36  ;;  %2513 = vmatpush1.bf16.msra.mxu0 %v5238_v62  ;;  %v5248_v62 = vld [vmem:[#allocation58_spill] sm:$0xff] }
 0x2e3   : > { %1809 = vmatprep.subr.bf16.mxu1 %v4511_v39  ;;  %2514 = vmatprep.subr.bf16.mxu0 %v5239_v0  ;;  %v1449_v51 = vpop.permute.xlu1 %1448  ;;  %v5283_v0 = vld [vmem:[#allocation38_spill] sm:$0xff] }
 0x2e4   : > { %v4566_v30 = vsel %vm793_vm8, %v1449_v51, %v1451_v13  ;;  %v5261_v13 = vld [vmem:[#allocation31_spill] sm:$0xff] }
 0x2e6   : > { %1810 = vmatpush1.bf16.msra.mxu1 %v4517_v60  ;;  %2515 = vmatpush1.bf16.msra.mxu0 %v5240_v20 }
 0x2e7   : > { %1811 = vmatprep.subr.bf16.mxu1 %v5241_v26  ;;  %2516 = vmatprep.subr.bf16.mxu0 %v5242_v27  ;;  %v4560_v27 = vsel %vm746_vm7, %v4388_v50, %v1403_v40  ;;  %v5249_v50 = vld [vmem:[#allocation21_spill] sm:$0xff]  ;;  %v5257_v40 = vld [vmem:[#allocation20_spill] sm:$0xff] }
 0x2ea   : > { %1812 = vmatpush1.bf16.msra.mxu1 %v5243_v31  ;;  %2517 = vmatpush1.bf16.msra.mxu0 %v5244_v34  ;;  %v5252_v34 = vld [vmem:[#allocation24_spill] sm:$0xff] }
 0x2eb   : > { %1813 = vmatprep.subr.bf16.mxu1 %v4526_v42  ;;  %2518 = vmatprep.subr.bf16.mxu0 %v5245_v7  ;;  %v5253_v7 = vld [vmem:[#allocation25_spill] sm:$0xff] }
 0x2ee   : > { %1814 = vmatpush1.bf16.msra.mxu1 %v4532_v46  ;;  %2519 = vmatpush1.bf16.msra.mxu0 %v5246_v11  ;;  %v5256_v11 = vld [vmem:[#allocation28_spill] sm:$0xff] }
 0x2ef   : > { %1815 = vmatprep.subr.bf16.mxu1 %v4542_v17  ;;  %2531 = vmatprep.subr.bf16.mxu0 %v5247_v58  ;;  %v5258_v58 = vld [vmem:[#allocation19_spill] sm:$0xff] }
 0x2f1   : > { %2521 = vmatmul.mubr.bf16.vlgmr.msra.gmra.mrb[12].mxu0 %v4537_v57 }
 0x2f2   : > { %1816 = vmatpush1.bf16.msra.mxu1 %v4548_v21  ;;  %2532 = vmatpush1.bf16.msra.mxu0 %v5248_v62  ;;  %v5260_v62 = vld [vmem:[#allocation30_spill] sm:$0xff] }
 0x2f3   : > { %1828 = vmatprep.subr.bf16.mxu1 %v4554_v23  ;;  %2533 = vmatprep.subr.bf16.mxu0 %v4340_v45  ;;  %v4572_v45 = vsel %vm793_vm8, %v4418_v29, %v1449_v51  ;;  %v5255_v29 = vld [vmem:[#allocation27_spill] sm:$0xff]  ;;  %v5262_v51 = vld [vmem:[#allocation32_spill] sm:$0xff] }
 0x2f5   : > { %1818 = vmatmul.mubr.bf16.vlgmr.msra.gmra.mrb[12].mxu1 %v4303_v12  ;;  %v5250_v12 = vld [vmem:[#allocation22_spill] sm:$0xff] }
 0x2f6   : > { %1829 = vmatpush1.bf16.msra.mxu1 %v4560_v27  ;;  %2534 = vmatpush1.bf16.msra.mxu0 %v4336_v35  ;;  %v5251_v35 = vld [vmem:[#allocation23_spill] sm:$0xff] }
 0x2f7   : > { %1830 = vmatprep.subr.bf16.mxu1 %v4566_v30  ;;  %1860 = vmatprep.mubr.bf16.mxu1 %v5213_v41 }
 0x2fa   : > { %1831 = vmatpush1.bf16.msra.mxu1 %v4572_v45 }
 0x2fb   : > { %2574 = vmatprep.subr.bf16.mxu1 %v5249_v50  ;;  %v5263_v50 = vld [vmem:[#allocation33_spill] sm:$0xff] }
 0x301   : > { %3108 = vmatmul.mubr.msk.bf16.vlgmr.msra.gmra.mrb[12].mxu1 %vm1609_vm9, %v4349_v28  ;;  %v5259_v28 = vld [vmem:[#allocation29_spill] sm:$0xff] }
 0x302   : > { %2575 = vmatpush1.bf16.msra.mxu1 %v5250_v12  ;;  %2606 = vmatprep.mubr.bf16.mxu1 %v4427_v9  ;;  %v5264_v12 = vld [vmem:[#allocation34_spill] sm:$0xff] }
 0x303   : > { %2576 = vmatprep.subr.bf16.mxu1 %v5251_v35  ;;  %v5265_v35 = vld [vmem:[#allocation35_spill] sm:$0xff] }
 0x306   : > { %2577 = vmatpush1.bf16.msra.mxu1 %v5252_v34  ;;  %v5266_v34 = vld [vmem:[#allocation36_spill] sm:$0xff] }
 0x307   : > { %2578 = vmatprep.subr.bf16.mxu1 %v5253_v7  ;;  %v5267_v7 = vld [vmem:[#allocation60_spill] sm:$0xff] }
 0x30a   : > { %2579 = vmatpush1.bf16.msra.mxu1 %v5254_v56  ;;  %v5268_v56 = vld [vmem:[#allocation61_spill] sm:$0xff] }
 0x30b   : > { %2580 = vmatprep.subr.bf16.mxu1 %v5255_v29  ;;  %v5269_v29 = vld [vmem:[#allocation62_spill] sm:$0xff] }
 0x30e   : > { %2581 = vmatpush1.bf16.msra.mxu1 %v5256_v11  ;;  %v5270_v11 = vld [vmem:[#allocation63_spill] sm:$0xff] }
 0x30f   : > { %2582 = vmatprep.subr.bf16.mxu1 %v5257_v40 }
 0x312   : > { %2583 = vmatpush1.bf16.msra.mxu1 %v5258_v58 }
 0x313   : > { %2584 = vmatprep.subr.bf16.mxu1 %v5259_v28  ;;  %v5271_v28 = vld [vmem:[#allocation64_spill] sm:$0xff] }
 0x316   : > { %2585 = vmatpush1.bf16.msra.mxu1 %v5260_v62  ;;  %v5272_v62 = vld [vmem:[#allocation65_spill] sm:$0xff] }
 0x317   : > { %2586 = vmatprep.subr.bf16.mxu1 %v5261_v13  ;;  %v5273_v13 = vld [vmem:[#allocation66_spill] sm:$0xff] }
 0x31a   : > { %2587 = vmatpush1.bf16.msra.mxu1 %v5262_v51  ;;  %v5274_v51 = vld [vmem:[#allocation46_spill] sm:$0xff] }
 0x31b   : > { %2588 = vmatprep.subr.bf16.mxu1 %v5263_v50  ;;  %v5275_v50 = vld [vmem:[#allocation45_spill] sm:$0xff] }
 0x31e   : > { %2589 = vmatpush1.bf16.msra.mxu1 %v5264_v12  ;;  %v5276_v12 = vld [vmem:[#allocation67_spill] sm:$0xff] }
 0x31f   : > { %2590 = vmatprep.subr.bf16.mxu1 %v5265_v35  ;;  %v5277_v35 = vld [vmem:[#allocation68_spill] sm:$0xff] }
 0x322   : > { %2591 = vmatpush1.bf16.msra.mxu1 %v5266_v34 }
 0x323   : > { %2592 = vmatprep.subr.bf16.mxu1 %v5267_v7 }
 0x326   : > { %2593 = vmatpush1.bf16.msra.mxu1 %v5268_v56  ;;  %v4618_v56 = vpop.permute.xlu0 %1591 }
 0x327   : > { %2594 = vmatprep.subr.bf16.mxu1 %v5269_v29 }
 0x32a   : > { %2595 = vmatpush1.bf16.msra.mxu1 %v5270_v11 }
 0x32b   : > { %2596 = vmatprep.subr.bf16.mxu1 %v5271_v28 }
 0x32e   : > { %2597 = vmatpush1.bf16.msra.mxu1 %v5272_v62 }
 0x32f   : > { %2598 = vmatprep.subr.bf16.mxu1 %v4371_v5  ;;  %v4615_v5 = vpop.permute.xlu1 %1586 }
 0x332   : > { %2599 = vmatpush1.bf16.msra.mxu1 %v5273_v13  ;;  %v5278_v13 = vld [vmem:[#allocation39_spill] sm:$0xff] }
 0x333   : > { %2600 = vmatprep.subr.bf16.mxu1 %v5274_v51 }
 0x336   : > { %2601 = vmatpush1.bf16.msra.mxu1 %v5275_v50 }
 0x337   : > { %2602 = vmatprep.subr.bf16.mxu1 %v5276_v12 }
 0x33a   : > { %2603 = vmatpush1.bf16.msra.mxu1 %v4396_v61 }
 0x33b   : > { %2604 = vmatprep.subr.bf16.mxu1 %v4409_v24 }
 0x33e   : > { %2605 = vmatpush1.bf16.msra.mxu1 %v4413_v63 }
 0x33f   : > { %2617 = vmatprep.subr.bf16.mxu1 %v4392_v15 }
 0x341   : > { %2607 = vmatmul.mubr.bf16.vlgmr.msra.gmra.mrb[16].mxu1 %v4537_v57 }
 0x342   : > { %2618 = vmatpush1.bf16.msra.mxu1 %v5277_v35 }
 0x343   : > { %2619 = vmatprep.subr.bf16.mxu1 %v4422_v49 }
 0x346   : > { %2620 = vmatpush1.bf16.msra.mxu1 %v4431_v10 }
 0x370   : > { %v1690_v34 = vpop.f32.mrb[4].mxu1 }
 0x371   : > { %v3123_v7 = vadd.f32 %v1690_v34, %v4615_v5  ;;  %v1692_v61 = vpop.f32.mrb[5].mxu1  ;;  %v5279_v34 = vld [vmem:[#allocation40_spill] sm:$0xff] }
 0x372   : > { %v3124_v24 = vadd.f32 %v1692_v61, %v4615_v5  ;;  %v1694_v63 = vpop.f32.mrb[6].mxu1 }
 0x373   : > { %v1871_v15 = vmax.f32 %v3123_v7, 0.0  ;;  %v3125_v29 = vadd.f32 %v1694_v63, %v4618_v56  ;;  %v1696_v11 = vpop.f32.mrb[7].mxu1 }
 0x374   : > { %v1872_v28 = vmax.f32 %v3124_v24, 0.0  ;;  %v3126_v49 = vadd.f32 %v1696_v11, %v4618_v56 }
 0x375   : > { %v1877_v62 = vmax.f32 %v3125_v29, 0.0  ;;  %v1883_v12 = vmul.f32 %v1871_v15, %v5278_v13 }
 0x376   : > { %v1878_v10 = vmax.f32 %v3126_v49, 0.0  ;;  %v1884_v50 = vmul.f32 %v1872_v28, %v5279_v34 }
 0x377   : > { %v1889_v35 = vmul.f32 %v1877_v62, %v5278_v13 }
 0x378   : > { %v1890_v51 = vmul.f32 %v1878_v10, %v5279_v34 }
 0x379   : > { %v4627_v58 = vpack.c.bf16 %v1889_v35, %v1883_v12 }
 0x37a   : > { %v4629_v61 = vpack.c.bf16 %v1890_v51, %v1884_v50 }
 0x37b   : > { %1969 = vrot.lane.b32.xlu0 %v4627_v58, %s3397_s24  ;;  %1923 = vrot.lane.b32.xlu1 %v4627_v58, %s3396_s27 }
 0x37f   : > { %1925 = vrot.lane.b32.xlu0 %v4629_v61, %s3396_s27  ;;  %2015 = vrot.lane.b32.xlu1 %v4627_v58, %s3398_s12 }
 0x383   : > { %2061 = vrot.lane.b32.xlu0 %v4627_v58, %s3399_s26  ;;  %1971 = vrot.lane.b32.xlu1 %v4629_v61, %s3397_s24 }
 0x384   : > { %v1733_v51 = vpop.f32.mrb[8].mxu0 }
 0x385   : > { %v1735_v50 = vpop.f32.mrb[9].mxu0  ;;  %v1734_v24 = vadd.f32 %v1733_v51, %v4615_v5 }
 0x386   : > { %v1737_v7 = vpop.f32.mrb[10].mxu0  ;;  %v1736_v15 = vadd.f32 %v1735_v50, %v4615_v5 }
 0x387   : > { %v1739_v63 = vpop.f32.mrb[11].mxu0  ;;  %2017 = vrot.lane.b32.xlu0 %v4629_v61, %s3398_s12  ;;  %2117 = vrot.lane.b32.xlu1 %v4627_v58, %s3400_s23  ;;  %v1738_v11 = vadd.f32 %v1737_v7, %v4618_v56  ;;  %v5280_v7 = vld [vmem:[#allocation43_spill] sm:$0xff] }
 0x388   : > { %v1776_v29 = vpop.f32.mrb[8].mxu1  ;;  %v1740_v62 = vadd.f32 %v1739_v63, %v4618_v56  ;;  %v5281_v63 = vld [vmem:[#allocation44_spill] sm:$0xff] }
 0x389   : > { %v1777_v28 = vadd.f32 %v1776_v29, %v1734_v24  ;;  %v1778_v49 = vpop.f32.mrb[9].mxu1 }
 0x38a   : > { %v1779_v10 = vadd.f32 %v1778_v49, %v1736_v15  ;;  %v1780_v12 = vpop.f32.mrb[10].mxu1 }
 0x38b   : > { %v1873_v35 = vmax.f32 %v1777_v28, 0.0  ;;  %v1781_v51 = vadd.f32 %v1780_v12, %v1738_v11  ;;  %v1782_v40 = vpop.f32.mrb[11].mxu1  ;;  %2059 = vrot.lane.b32.xlu0 %v5213_v41, %s3399_s26  ;;  %2063 = vrot.lane.b32.xlu1 %v4629_v61, %s3399_s26 }
 0x38c   : > { %v1874_v34 = vmax.f32 %v1779_v10, 0.0  ;;  %v1783_v50 = vadd.f32 %v1782_v40, %v1740_v62 }
 0x38d   : > { %v1879_v13 = vmax.f32 %v1781_v51, 0.0  ;;  %v1885_v24 = vmul.f32 %v1873_v35, %v5280_v7 }
 0x38e   : > { %v1880_v20 = vmax.f32 %v1783_v50, 0.0  ;;  %v1886_v15 = vmul.f32 %v1874_v34, %v5281_v63 }
 0x38f   : > { %v1891_v29 = vmul.f32 %v1879_v13, %v5280_v7  ;;  %2165 = vrot.lane.b32.xlu0 %v4629_v61, %s3401_s30  ;;  %2119 = vrot.lane.b32.xlu1 %v4629_v61, %s3400_s23 }
 0x390   : > { %v1892_v11 = vmul.f32 %v1880_v20, %v5281_v63  ;;  %v4678_v20 = vld [vmem:[%s5076_s6 + $0xc] ss:$16 sps:$4 sm:$0xff]  }
 0x391   : > { %v4663_v28 = vpack.c.bf16 %v1891_v29, %v1885_v24  ;;  %3113 = vmatprep.mubr.msk.bf16.mxu0 %vm2484_vm10, %v4678_v20  ;;  %3114 = vmatprep.mubr.msk.bf16.mxu1 %vm2484_vm10, %v4678_v20 }
 0x392   : > { %v4665_v49 = vpack.c.bf16 %v1892_v11, %v1886_v15  ;;  %v5282_v11 = vld [vmem:[#allocation37_spill] sm:$0xff] }
 0x393   : > { %2211 = vrot.lane.b32.xlu1 %v4629_v61, %s3402_s21  ;;  %2121 = vrot.lane.b32.xlu0 %v4663_v28, %s3400_s23 }
 0x397   : > { %2167 = vrot.lane.b32.xlu1 %v4663_v28, %s3401_s30  ;;  %2163 = vrot.lane.b32.xlu0 %v4627_v58, %s3401_s30 }
 0x39b   : > { %2209 = vrot.lane.b32.xlu1 %v4627_v58, %s3402_s21  ;;  %2213 = vrot.lane.b32.xlu0 %v4663_v28, %s3402_s21 }
 0x39f   : > { %2259 = vrot.lane.b32.xlu1 %v4663_v28, %s3403_s28  ;;  %2257 = vrot.lane.b32.xlu0 %v4629_v61, %s3403_s28 }
 0x3a3   : > { %1927 = vrot.lane.b32.xlu1 %v4663_v28, %s3396_s27  ;;  %2255 = vrot.lane.b32.xlu0 %v4627_v58, %s3403_s28 }
 0x3a7   : > { %1973 = vrot.lane.b32.xlu1 %v4663_v28, %s3397_s24  ;;  %1929 = vrot.lane.b32.xlu0 %v4665_v49, %s3396_s27 }
 0x3ab   : > { %2019 = vrot.lane.b32.xlu1 %v4663_v28, %s3398_s12  ;;  %1975 = vrot.lane.b32.xlu0 %v4665_v49, %s3397_s24 }
 0x3af   : > { %2065 = vrot.lane.b32.xlu1 %v4663_v28, %s3399_s26  ;;  %2021 = vrot.lane.b32.xlu0 %v4665_v49, %s3398_s12 }
 0x3b3   : > { %2123 = vrot.lane.b32.xlu1 %v4665_v49, %s3400_s23  ;;  %2067 = vrot.lane.b32.xlu0 %v4665_v49, %s3399_s26 }
 0x3b7   : > { %2169 = vrot.lane.b32.xlu1 %v4665_v49, %s3401_s30 }
 0x3bb   : > { %2215 = vrot.lane.b32.xlu1 %v4665_v49, %s3402_s21 }
 0x3d4   : > { %v1862_v40 = vpop.f32.mrb[12].mxu1 }
 0x3d5   : > { %v3135_v13 = vadd.f32 %v1862_v40, %v4615_v5  ;;  %v1864_v34 = vpop.f32.mrb[13].mxu1 }
 0x3d6   : > { %v3136_v62 = vadd.f32 %v1864_v34, %v4615_v5  ;;  %v1866_v10 = vpop.f32.mrb[14].mxu1 }
 0x3d7   : > { %v1875_v12 = vmax.f32 %v3135_v13, 0.0  ;;  %v3137_v35 = vadd.f32 %v1866_v10, %v4618_v56  ;;  %v1868_v51 = vpop.f32.mrb[15].mxu1 }
 0x3d8   : > { %v1876_v50 = vmax.f32 %v3136_v62, 0.0  ;;  %v3138_v24 = vadd.f32 %v1868_v51, %v4618_v56  ;;  %v1922_v56 = vpop.permute.xlu1 %1921 }
 0x3d9   : > { %v1881_v29 = vmax.f32 %v3137_v35, 0.0  ;;  %v1887_v63 = vmul.f32 %v1875_v12, %v5282_v11 }
 0x3da   : > { %v1882_v15 = vmax.f32 %v3138_v24, 0.0  ;;  %v1888_v4 = vmul.f32 %v1876_v50, %v5283_v0 }
 0x3db   : > { %v1893_v7 = vmul.f32 %v1881_v29, %v5282_v11 }
 0x3dc   : > { %v1894_v40 = vmul.f32 %v1882_v15, %v5283_v0 }
 0x3dd   : > { %v4724_v6 = vpack.c.bf16 %v1893_v7, %v1887_v63  ;;  %v1968_v7 = vpop.permute.xlu0 %1967 }
 0x3de   : > { %v4726_v5 = vpack.c.bf16 %v1894_v40, %v1888_v4  ;;  %v2014_v4 = vpop.permute.xlu1 %2013 }
 0x3df   : > { %1931 = vrot.lane.b32.xlu1 %v4724_v6, %s3396_s27  ;;  %2125 = vrot.lane.b32.xlu0 %v4724_v6, %s3400_s23 }
 0x3e3   : > { %1977 = vrot.lane.b32.xlu1 %v4724_v6, %s3397_s24  ;;  %2171 = vrot.lane.b32.xlu0 %v4724_v6, %s3401_s30 }
 0x3e7   : > { %2023 = vrot.lane.b32.xlu1 %v4724_v6, %s3398_s12  ;;  %2217 = vrot.lane.b32.xlu0 %v4724_v6, %s3402_s21 }
 0x3eb   : > { %2069 = vrot.lane.b32.xlu1 %v4724_v6, %s3399_s26  ;;  %1933 = vrot.lane.b32.xlu0 %v4726_v5, %s3396_s27  ;;  %s4997_s27 = scalar_lea.vmem [#allocation9], %s3173_s15  ;;  %s3174_s15 = smul.u32 1536, %s3483_s17 }
 0x3ed   : > { %v1924_v63 = vpop.permute.xlu1 %1923  ;;  %v1970_v13 = vpop.permute.xlu0 %1969  ;;  %s5021_s17 = scalar_lea.hbm %s5080_s10, %s3174_s15 }
 0x3ee   : > { %v1935_v12 = vsel %vm452_vm1, %v1922_v56, %v1924_v63  ;;  %v1981_v24 = vsel %vm499_vm2, %v1968_v7, %v1970_v13 }
 0x3ef   : > { %2261 = vrot.lane.b32.xlu1 %v4665_v49, %s3403_s28  ;;  %1979 = vrot.lane.b32.xlu0 %v4726_v5, %s3397_s24  ;;  %s3008_s24 = sshll.u32 %s4997_s27, 4  ;;  %s5023_s24 = int_to_ptr.vmem [resolvable:$true] %s3008_s24 }
 0x3f1   : > { %v2016_v34 = vpop.permute.xlu1 %2015  ;;  %v4748_v62 = vpop.permute.xlu0 %1925 }
 0x3f2   : > { %v1936_v10 = vsel %vm452_vm1, %v1924_v63, %v4748_v62  ;;  %v2027_v56 = vsel %vm546_vm3, %v2014_v4, %v2016_v34  ;;  %v2453_v4 = vld [vmem:[%s5077_s7] sm:$0xff] }
 0x3f3   : > { %2127 = vrot.lane.b32.xlu1 %v4726_v5, %s3400_s23  ;;  %2025 = vrot.lane.b32.xlu0 %v4726_v5, %s3398_s12 }
 0x3f4   : > { %2535 = vmatprep.subr.bf16.mxu0 %v1936_v10 }
 0x3f5   : > { %2536 = vmatpush1.bf16.msra.mxu0 %v1935_v12  ;;  %v4757_v35 = vpop.permute.xlu1 %1971  ;;  %v2062_v51 = vpop.permute.xlu0 %2061 }
 0x3f6   : > { %v1982_v50 = vsel %vm499_vm2, %v1970_v13, %v4757_v35 }
 0x3f7   : > { %2173 = vrot.lane.b32.xlu1 %v4726_v5, %s3401_s30  ;;  %2071 = vrot.lane.b32.xlu0 %v4726_v5, %s3399_s26 }
 0x3f8   : > { %2537 = vmatprep.subr.bf16.mxu0 %v1982_v50 }
 0x3f9   : > { %2538 = vmatpush1.bf16.msra.mxu0 %v1981_v24  ;;  %v2118_v29 = vpop.permute.xlu1 %2117  ;;  %v4766_v15 = vpop.permute.xlu0 %2017 }
 0x3fa   : > { %v2028_v40 = vsel %vm546_vm3, %v2016_v34, %v4766_v15 }
 0x3fb   : > { %2219 = vrot.lane.b32.xlu1 %v4726_v5, %s3402_s21  ;;  %2263 = vrot.lane.b32.xlu0 %v4724_v6, %s3403_s28 }
 0x3fc   : > { %2539 = vmatprep.subr.bf16.mxu0 %v2028_v40 }
 0x3fd   : > { %2540 = vmatpush1.bf16.msra.mxu0 %v2027_v56  ;;  %v4775_v63 = vpop.permute.xlu1 %2063  ;;  %v2060_v7 = vpop.permute.xlu0 %2059 }
 0x3fe   : > { %v2073_v13 = vsel %vm593_vm4, %v2060_v7, %v2062_v51  ;;  %v2074_v10 = vsel %vm593_vm4, %v2062_v51, %v4775_v63  ;;  %v2808_v51 = vld [vmem:[%s5079_s9] sm:$0xff] }
 0x3ff   : > { %2265 = vrot.lane.b32.xlu1 %v4726_v5, %s3403_s28  ;;  %2129 = vrot.lane.b32.xlu0 %v5213_v41, %s3400_s23  ;;  %s2995_s23 = scalar_lea.sflag [#allocation6], %s3598_s20 }
 0x400   : > { %2541 = vmatprep.subr.bf16.mxu0 %v2074_v10 }
 0x401   : > { %2542 = vmatpush1.bf16.msra.mxu0 %v2073_v13  ;;  %v2120_v34 = vpop.permute.xlu1 %2119  ;;  %v2166_v12 = vpop.permute.xlu0 %2165 }
 0x402   : > { %2543 = vmatprep.subr.bf16.mxu0 %v4629_v61  ;;  %v2131_v56 = vsel %vm652_vm5, %v2118_v29, %v2120_v34 }
 0x403   : > { %2457 = vperm.xlu1 %3246, %v2453_v4   ;;  %2175 = vrot.lane.b32.xlu0 %v5213_v41, %s3401_s30  ;;  %s3404_s30 = smov [#allocation9]  }
 0x405   : > { %2544 = vmatpush1.bf16.msra.mxu0 %v4627_v58  ;;  %v2212_v50 = vpop.permute.xlu1 %2211  ;;  %v4794_v24 = vpop.permute.xlu0 %2121 }
 0x406   : > { %v2132_v40 = vsel %vm652_vm5, %v2120_v34, %v4794_v24 }
 0x407   : > { %2812 = vperm.xlu1 %3246, %v2808_v51   ;;  %2221 = vrot.lane.b32.xlu0 %v5213_v41, %s3402_s21  ;;  %v2454_v51 = vld [vmem:[%s5077_s7 + $0x8] sm:$0xff]  ;;  %s3323_s21 = sshll.u32 %s3404_s30, 4  ;;  %s3324_s21 = int_to_ptr.vmem [resolvable:$false] %s3323_s21 }
 0x408   : > { %2545 = vmatprep.subr.bf16.mxu0 %v2132_v40  ;;  %s3325_s29 = scalar_lea.vmem %s3324_s21, 3072  ;;  %p3326_p5 = scmp.lt.s32.totalorder %s5023_s24, %s3324_s21 }
 0x409   : > { %2546 = vmatpush1.bf16.msra.mxu0 %v2131_v56  ;;  %v4801_v7 = vpop.permute.xlu1 %2167  ;;  %v2164_v13 = vpop.permute.xlu0 %2163 }
 0x40a   : > { %v2177_v10 = vsel %vm699_vm6, %v2164_v13, %v2166_v12  ;;  %v2178_v4 = vsel %vm699_vm6, %v2166_v12, %v4801_v7  ;;  %v2809_v12 = vld [vmem:[%s5079_s9 + $0x8] sm:$0xff] }
 0x40b   : > { %2267 = vrot.lane.b32.xlu0 %v5213_v41, %s3403_s28  ;;  %2547 = vmatprep.subr.bf16.mxu0 %v2178_v4 }
 0x40d   : > { %2548 = vmatpush1.bf16.msra.mxu0 %v2177_v10  ;;  %v2210_v29 = vpop.permute.xlu1 %2209  ;;  %v4811_v34 = vpop.permute.xlu0 %2213 }
 0x40e   : > { %v2223_v40 = vsel %vm746_vm7, %v2210_v29, %v2212_v50  ;;  %v2224_v56 = vsel %vm746_vm7, %v2212_v50, %v4811_v34  ;;  %v4827_v50 = vld [vmem:[%s5076_s6 + $0x8] ss:$16 sps:$4 sm:$0xff]  }
 0x40f   : > { %2462 = vperm.xlu0 %3245, %v2454_v51   ;;  %2549 = vmatprep.subr.bf16.mxu0 %v2224_v56 }
 0x411   : > { %2550 = vmatpush1.bf16.msra.mxu0 %v2223_v40  ;;  %v4819_v13 = vpop.permute.xlu1 %2259  ;;  %v2258_v4 = vpop.permute.xlu0 %2257 }
 0x412   : > { %v2270_v10 = vsel %vm793_vm8, %v2258_v4, %v4819_v13 }
 0x413   : > { %2817 = vperm.xlu0 %3245, %v2809_v12   ;;  %2551 = vmatprep.subr.bf16.mxu0 %v2270_v10 }
 0x415   : > { %v1928_v0 = vpop.permute.xlu1 %1927  ;;  %v2256_v29 = vpop.permute.xlu0 %2255 }
 0x416   : > { %v2269_v11 = vsel %vm793_vm8, %v2256_v29, %v2258_v4  ;;  %v1937_v12 = vsel %vm452_vm1, %v4748_v62, %v1928_v0  ;;  %v5284_v29 = vld [vmem:[#allocation18_spill] sm:$0xff] }
 0x417   : > { %2552 = vmatpush1.bf16.msra.mxu0 %v2269_v11 }
 0x418   : > { %2660 = vmatprep.subr.bf16.mxu0 %v3939_v47 }
 0x419   : > { %v1974_v51 = vpop.permute.xlu1 %1973  ;;  %v4830_v40 = vpop.permute.xlu0 %1929 }
 0x41a   : > { %2564 = vmatmul.mubr.bf16.vlgmr.msra.gmra.mrb[12].mxu0 %v4827_v50  ;;  %v1938_v56 = vsel %vm452_vm1, %v1928_v0, %v4830_v40  ;;  %v1983_v10 = vsel %vm499_vm2, %v4757_v35, %v1974_v51 }
 0x41b   : > { %2621 = vmatprep.subr.bf16.mxu1 %v1938_v56  ;;  %2661 = vmatpush1.bf16.msra.mxu0 %v3943_v48  ;;  %v5286_v56 = vld [vmem:[#allocation42_spill] sm:$0xff] }
 0x41c   : > { %2622 = vmatpush1.bf16.msra.mxu1 %v1937_v12  ;;  %2662 = vmatprep.subr.bf16.mxu0 %v3963_v2 }
 0x41d   : > { %v4839_v11 = vpop.permute.xlu0 %1975  ;;  %2692 = vmatprep.mubr.bf16.mxu0 %v4427_v9  ;;  %v2020_v47 = vpop.permute.xlu1 %2019 }
 0x41e   : > { %v1984_v4 = vsel %vm499_vm2, %v1974_v51, %v4839_v11  ;;  %v2029_v9 = vsel %vm546_vm3, %v4766_v15, %v2020_v47 }
 0x41f   : > { %2623 = vmatprep.subr.bf16.mxu1 %v1984_v4  ;;  %2663 = vmatpush1.bf16.msra.mxu0 %v3967_v3  ;;  %v5287_v4 = vld [vmem:[#allocation41_spill] sm:$0xff] }
 0x420   : > { %2624 = vmatpush1.bf16.msra.mxu1 %v1983_v10  ;;  %2664 = vmatprep.subr.bf16.mxu0 %v3975_v14 }
 0x421   : > { %v4848_v48 = vpop.permute.xlu0 %2021  ;;  %v2066_v0 = vpop.permute.xlu1 %2065 }
 0x422   : > { %v2030_v2 = vsel %vm546_vm3, %v2020_v47, %v4848_v48  ;;  %v2075_v14 = vsel %vm593_vm4, %v4775_v63, %v2066_v0 }
 0x423   : > { %2625 = vmatprep.subr.bf16.mxu1 %v2030_v2  ;;  %2665 = vmatpush1.bf16.msra.mxu0 %v3979_v25 }
 0x424   : > { %2626 = vmatpush1.bf16.msra.mxu1 %v2029_v9  ;;  %2666 = vmatprep.subr.bf16.mxu0 %v3986_v32 }
 0x425   : > { %v4856_v62 = vpop.permute.xlu0 %2067  ;;  %v2124_v25 = vpop.permute.xlu1 %2123 }
 0x426   : > { %v2076_v3 = vsel %vm593_vm4, %v2066_v0, %v4856_v62 }
 0x427   : > { %2627 = vmatprep.subr.bf16.mxu1 %v2076_v3  ;;  %2667 = vmatpush1.bf16.msra.mxu0 %v3989_v33 }
 0x428   : > { %2628 = vmatpush1.bf16.msra.mxu1 %v2075_v14  ;;  %2668 = vmatprep.subr.bf16.mxu0 %v3719_v19 }
 0x429   : > { %2629 = vmatprep.subr.bf16.mxu1 %v4665_v49  ;;  %v2170_v32 = vpop.permute.xlu1 %2169 }
 0x42b   : > { %2669 = vmatpush1.bf16.msra.mxu0 %v3703_v16 }
 0x42c   : > { %2630 = vmatpush1.bf16.msra.mxu1 %v4663_v28  ;;  %2670 = vmatprep.subr.bf16.mxu0 %v3997_v44 }
 0x42d   : > { %v2216_v33 = vpop.permute.xlu1 %2215 }
 0x42f   : > { %2671 = vmatpush1.bf16.msra.mxu0 %v4008_v55 }
 0x430   : > { %2672 = vmatprep.subr.bf16.mxu0 %v4004_v52 }
 0x433   : > { %2673 = vmatpush1.bf16.msra.mxu0 %v4019_v8 }
 0x434   : > { %2674 = vmatprep.subr.bf16.mxu0 %v4015_v54  ;;  %v2133_v54 = vsel %vm652_vm5, %v4794_v24, %v2124_v25 }
 0x437   : > { %2675 = vmatpush1.bf16.msra.mxu0 %v4030_v38 }
 0x438   : > { %2676 = vmatprep.subr.bf16.mxu0 %v4026_v59 }
 0x43b   : > { %2677 = vmatpush1.bf16.msra.mxu0 %v4038_v22  ;;  %v2179_v22 = vsel %vm699_vm6, %v4801_v7, %v2170_v32 }
 0x43c   : > { %2678 = vmatprep.subr.bf16.mxu0 %v4478_v37 }
 0x43f   : > { %2679 = vmatpush1.bf16.msra.mxu0 %v4484_v43 }
 0x440   : > { %2680 = vmatprep.subr.bf16.mxu0 %v4489_v53 }
 0x443   : > { %2681 = vmatpush1.bf16.msra.mxu0 %v4495_v1  ;;  %v2225_v1 = vsel %vm746_vm7, %v4811_v34, %v2216_v33 }
 0x444   : > { %2682 = vmatprep.subr.bf16.mxu0 %v4500_v18 }
 0x447   : > { %2683 = vmatpush1.bf16.msra.mxu0 %v4506_v36 }
 0x448   : > { %2684 = vmatprep.subr.bf16.mxu0 %v4511_v39 }
 0x44b   : > { %2685 = vmatpush1.bf16.msra.mxu0 %v4517_v60 }
 0x44c   : > { %2686 = vmatprep.subr.bf16.mxu0 %v5241_v26 }
 0x44f   : > { %2687 = vmatpush1.bf16.msra.mxu0 %v5243_v31 }
 0x450   : > { %2688 = vmatprep.subr.bf16.mxu0 %v4526_v42 }
 0x451   : > { %v1932_v44 = vpop.permute.xlu1 %1931  ;;  %v4886_v52 = vpop.permute.xlu0 %2125 }
 0x452   : > { %v2134_v55 = vsel %vm652_vm5, %v2124_v25, %v4886_v52  ;;  %v1939_v42 = vsel %vm452_vm1, %v4830_v40, %v1932_v44  ;;  %v5285_v40 = vld [vmem:[#allocation17_spill] sm:$0xff] }
 0x453   : > { %2631 = vmatprep.subr.bf16.mxu1 %v2134_v55  ;;  %2689 = vmatpush1.bf16.msra.mxu0 %v4532_v46 }
 0x454   : > { %2632 = vmatpush1.bf16.msra.mxu1 %v2133_v54  ;;  %2690 = vmatprep.subr.bf16.mxu0 %v4542_v17 }
 0x455   : > { %v1978_v8 = vpop.permute.xlu1 %1977  ;;  %v4894_v59 = vpop.permute.xlu0 %2171 }
 0x456   : > { %v2180_v38 = vsel %vm699_vm6, %v2170_v32, %v4894_v59 }
 0x457   : > { %2633 = vmatprep.subr.bf16.mxu1 %v2180_v38  ;;  %2691 = vmatpush1.bf16.msra.mxu0 %v4548_v21  ;;  %v1985_v21 = vsel %vm499_vm2, %v4839_v11, %v1978_v8 }
 0x458   : > { %2634 = vmatpush1.bf16.msra.mxu1 %v2179_v22  ;;  %2703 = vmatprep.subr.bf16.mxu0 %v4554_v23 }
 0x459   : > { %v2024_v37 = vpop.permute.xlu1 %2023  ;;  %v4902_v43 = vpop.permute.xlu0 %2217 }
 0x45a   : > { %v2226_v53 = vsel %vm746_vm7, %v2216_v33, %v4902_v43  ;;  %2693 = vmatmul.mubr.bf16.vlgmr.msra.gmra.mrb[16].mxu0 %v4537_v57 }
 0x45b   : > { %2635 = vmatprep.subr.bf16.mxu1 %v2226_v53  ;;  %2704 = vmatpush1.bf16.msra.mxu0 %v4560_v27 }
 0x45c   : > { %2636 = vmatpush1.bf16.msra.mxu1 %v2225_v1  ;;  %2705 = vmatprep.subr.bf16.mxu0 %v4566_v30  ;;  %v2031_v30 = vsel %vm546_vm3, %v4848_v48, %v2024_v37  ;;  %v5289_v1 = vld [vmem:[#allocation40_spill] sm:$0xff] }
 0x45d   : > { %v1934_v18 = vpop.permute.xlu0 %1933  ;;  %3115 = vmatprep.mubr.msk.bf16.mxu0 %vm2484_vm10, %v4678_v20  ;;  %v2070_v39 = vpop.permute.xlu1 %2069 }
 0x45e   : > { %v1940_v36 = vsel %vm452_vm1, %v1932_v44, %v1934_v18  ;;  %v2077_v15 = vsel %vm593_vm4, %v4856_v62, %v2070_v39 }
 0x45f   : > { %2706 = vmatpush1.bf16.msra.mxu0 %v4572_v45 }
 0x460   : > { %2707 = vmatprep.subr.bf16.mxu0 %v1940_v36 }
 0x461   : > { %v1980_v60 = vpop.permute.xlu0 %1979  ;;  %v2262_v57 = vpop.permute.xlu1 %2261 }
 0x462   : > { %v1986_v46 = vsel %vm499_vm2, %v1978_v8, %v1980_v60  ;;  %v2271_v24 = vsel %vm793_vm8, %v4819_v13, %v2262_v57 }
 0x463   : > { %2708 = vmatpush1.bf16.msra.mxu0 %v1939_v42  ;;  %v3260_v42 = vld [vmem:[%s5078_s8] sm:$0xff]  }
 0x464   : > { %2709 = vmatprep.subr.bf16.mxu0 %v1986_v46  ;;  %v5290_v46 = vld [vmem:[#allocation20_spill] sm:$0xff] }
 0x465   : > { %v2026_v17 = vpop.permute.xlu0 %2025  ;;  %v2128_v20 = vpop.permute.xlu1 %2127 }
 0x466   : > { %v2032_v23 = vsel %vm546_vm3, %v2024_v37, %v2026_v17  ;;  %v2135_v12 = vsel %vm652_vm5, %v4886_v52, %v2128_v20  ;;  %v5292_v17 = vld [vmem:[#allocation46_spill] sm:$0xff] }
 0x467   : > { %2710 = vmatpush1.bf16.msra.mxu0 %v1985_v21  ;;  %v5293_v21 = vld [vmem:[#allocation45_spill] sm:$0xff] }
 0x468   : > { %2711 = vmatprep.subr.bf16.mxu0 %v2032_v23 }
 0x469   : > { %v2072_v27 = vpop.permute.xlu0 %2071  ;;  %v2174_v7 = vpop.permute.xlu1 %2173 }
 0x46a   : > { %v2078_v45 = vsel %vm593_vm4, %v2070_v39, %v2072_v27  ;;  %v2181_v48 = vsel %vm699_vm6, %v4894_v59, %v2174_v7 }
 0x46b   : > { %2712 = vmatpush1.bf16.msra.mxu0 %v2031_v30 }
 0x46c   : > { %2713 = vmatprep.subr.bf16.mxu0 %v2078_v45 }
 0x46d   : > { %v2264_v35 = vpop.permute.xlu0 %2263  ;;  %v2220_v47 = vpop.permute.xlu1 %2219 }
 0x46e   : > { %v2272_v63 = vsel %vm793_vm8, %v2262_v57, %v2264_v35  ;;  %v2227_v62 = vsel %vm746_vm7, %v4902_v43, %v2220_v47  ;;  %v5288_v43 = vld [vmem:[#allocation39_spill] sm:$0xff] }
 0x46f   : > { %2637 = vmatprep.subr.bf16.mxu1 %v2272_v63  ;;  %2714 = vmatpush1.bf16.msra.mxu0 %v2077_v15  ;;  %v5291_v57 = vld [vmem:[#allocation19_spill] sm:$0xff] }
 0x470   : > { %2638 = vmatpush1.bf16.msra.mxu1 %v2271_v24  ;;  %2715 = vmatprep.subr.bf16.mxu0 %v4726_v5 }
 0x471   : > { %v2130_v34 = vpop.permute.xlu0 %2129  ;;  %2829 = vmatprep.subr.bf16.mxu1 %v5284_v29  ;;  %v2266_v9 = vpop.permute.xlu1 %2265 }
 0x472   : > { %v2136_v51 = vsel %vm652_vm5, %v2128_v20, %v2130_v34 }
 0x473   : > { %2650 = vmatmul.mubr.bf16.vlgmr.msra.gmra.mrb[16].mxu1 %v4827_v50  ;;  %2716 = vmatpush1.bf16.msra.mxu0 %v4724_v6 }
 0x474   : > { %2717 = vmatprep.subr.bf16.mxu0 %v2136_v51  ;;  %2830 = vmatpush1.bf16.msra.mxu1 %v5285_v40  ;;  %v5294_v51 = vld [vmem:[#allocation43_spill] sm:$0xff] }
 0x475   : > { %2831 = vmatprep.subr.bf16.mxu1 %v5286_v56  ;;  %v2176_v13 = vpop.permute.xlu0 %2175  ;;  %2861 = vmatprep.mubr.bf16.mxu1 %v5213_v41  ;;  %v5295_v56 = vld [vmem:[#allocation44_spill] sm:$0xff] }
 0x476   : > { %v2182_v11 = vsel %vm699_vm6, %v2174_v7, %v2176_v13 }
 0x477   : > { %2718 = vmatpush1.bf16.msra.mxu0 %v2135_v12 }
 0x478   : > { %2719 = vmatprep.subr.bf16.mxu0 %v2182_v11  ;;  %2832 = vmatpush1.bf16.msra.mxu1 %v5287_v4 }
 0x479   : > { %2833 = vmatprep.subr.bf16.mxu1 %v4629_v61  ;;  %v2222_v10 = vpop.permute.xlu0 %2221  ;;  %v2273_v61 = vsel %vm793_vm8, %v2264_v35, %v2266_v9 }
 0x47a   : > { %v2228_v2 = vsel %vm746_vm7, %v2220_v47, %v2222_v10 }
 0x47b   : > { %2720 = vmatpush1.bf16.msra.mxu0 %v2181_v48 }
 0x47c   : > { %2721 = vmatprep.subr.bf16.mxu0 %v2228_v2  ;;  %2834 = vmatpush1.bf16.msra.mxu1 %v4627_v58 }
 0x47d   : > { %v2268_v0 = vpop.permute.xlu0 %2267 }
 0x47e   : > { %v2274_v3 = vsel %vm793_vm8, %v2266_v9, %v2268_v0 }
 0x47f   : > { %2722 = vmatpush1.bf16.msra.mxu0 %v2227_v62 }
 0x480   : > { %2723 = vmatprep.subr.bf16.mxu0 %v2274_v3 }
 0x482   : > { %v2458_v14 = vpop.permute.xlu1 %2457 }
 0x483   : > { %2724 = vmatpush1.bf16.msra.mxu0 %v2273_v61 }
 0x486   : > { %2736 = vmatmul.mubr.bf16.vlgmr.msra.gmra.mrb[16].mxu0 %v4827_v50 }
 0x48e   : > { %v4951_v44 = vpop.permute.xlu0 %2462 }
 0x4ed   : > { %v2565_v25 = vpop.f32.mrb[12].mxu0 }
 0x4ee   : > { %v3139_v32 = vadd.f32 %v2565_v25, %v2458_v14  ;;  %v2567_v33 = vpop.f32.mrb[13].mxu0 }
 0x4ef   : > { %v3140_v58 = vadd.f32 %v2567_v33, %v2458_v14  ;;  %v2569_v52 = vpop.f32.mrb[14].mxu0 }
 0x4f0   : > { %v2746_v55 = vmax.f32 %v3139_v32, 0.0  ;;  %v3141_v54 = vadd.f32 %v2569_v52, %v4951_v44  ;;  %v2571_v8 = vpop.f32.mrb[15].mxu0 }
 0x4f1   : > { %v2747_v59 = vmax.f32 %v3140_v58, 0.0  ;;  %v3142_v38 = vadd.f32 %v2571_v8, %v4951_v44  ;;  %v2818_v8 = vpop.permute.xlu0 %2817 }
 0x4f2   : > { %v2752_v22 = vmax.f32 %v3141_v54, 0.0  ;;  %v2758_v53 = vmul.f32 %v2746_v55, %v5288_v43  ;;  %v2959_v54 = vld [vmem:[%s3604_s11 + $0x8] sm:$0xff] }
 0x4f3   : > { %v2753_v37 = vmax.f32 %v3142_v38, 0.0  ;;  %v2759_v18 = vmul.f32 %v2747_v59, %v5289_v1 }
 0x4f4   : > { %v2764_v50 = vmul.f32 %v2752_v22, %v5288_v43  ;;  %v2964_v22 = vld [vmem:[%s3604_s11 + $0x30] sm:$0xff] }
 0x4f5   : > { %v2765_v36 = vmul.f32 %v2753_v37, %v5289_v1 }
 0x4f6   : > { %v2770_v39 = vpack.c.bf16 %v2764_v50, %v2758_v53  ;;  %v2965_v50 = vld [vmem:[%s3604_s11 + $0x38] sm:$0xff] }
 0x4f7   : > { %v2771_v60 = vpack.c.bf16 %v2765_v36, %v2759_v18 }
 0x4f9   : > { %2835 = vmatprep.subr.bf16.mxu1 %v2771_v60 }
 0x4fa   : > { %2836 = vmatpush1.bf16.msra.mxu1 %v2770_v39 }
 0x4fb   : > { %2872 = vmatprep.subr.bf16.mxu1 %v5290_v46 }
 0x4fd   : > { %3117 = vmatmul.mubr.msk.bf16.vlgmr.msra.gmra.mrb[20].mxu1 %vm2825_vm11, %v3260_v42 }
 0x4fe   : > { %2873 = vmatpush1.bf16.msra.mxu1 %v5291_v57  ;;  %2904 = vmatprep.mubr.bf16.mxu1 %v5213_v41 }
 0x4ff   : > { %2874 = vmatprep.subr.bf16.mxu1 %v5292_v17  ;;  %v2961_v17 = vld [vmem:[%s3604_s11 + $0x18] sm:$0xff] }
 0x502   : > { %2875 = vmatpush1.bf16.msra.mxu1 %v5293_v21 }
 0x503   : > { %2876 = vmatprep.subr.bf16.mxu1 %v4665_v49 }
 0x506   : > { %2877 = vmatpush1.bf16.msra.mxu1 %v4663_v28 }
 0x546   : > { %v2651_v23 = vpop.f32.mrb[16].mxu1 }
 0x547   : > { %v3143_v27 = vadd.f32 %v2651_v23, %v2458_v14  ;;  %v2653_v30 = vpop.f32.mrb[17].mxu1 }
 0x548   : > { %v3144_v45 = vadd.f32 %v2653_v30, %v2458_v14  ;;  %v2655_v20 = vpop.f32.mrb[18].mxu1 }
 0x549   : > { %v2748_v35 = vmax.f32 %v3143_v27, 0.0  ;;  %v3145_v15 = vadd.f32 %v2655_v20, %v4951_v44  ;;  %v2657_v63 = vpop.f32.mrb[19].mxu1  ;;  %v2966_v27 = vld [vmem:[%s3604_s11 + $0x40] sm:$0xff] }
 0x54a   : > { %v2749_v24 = vmax.f32 %v3144_v45, 0.0  ;;  %v3146_v7 = vadd.f32 %v2657_v63, %v4951_v44 }
 0x54b   : > { %v2754_v34 = vmax.f32 %v3145_v15, 0.0  ;;  %v2760_v40 = vmul.f32 %v2748_v35, %v5294_v51  ;;  %v2967_v35 = vld [vmem:[%s3604_s11 + $0x48] sm:$0xff] }
 0x54c   : > { %v2755_v29 = vmax.f32 %v3146_v7, 0.0  ;;  %v2761_v28 = vmul.f32 %v2749_v24, %v5295_v56 }
 0x54d   : > { %v2766_v49 = vmul.f32 %v2754_v34, %v5294_v51 }
 0x54e   : > { %v2767_v13 = vmul.f32 %v2755_v29, %v5295_v56  ;;  %v2962_v29 = vld [vmem:[%s3604_s11 + $0x20] sm:$0xff] }
 0x54f   : > { %v2772_v12 = vpack.c.bf16 %v2766_v49, %v2760_v40  ;;  %v2963_v49 = vld [vmem:[%s3604_s11 + $0x28] sm:$0xff] }
 0x550   : > { %v2773_v11 = vpack.c.bf16 %v2767_v13, %v2761_v28  ;;  %v2968_v13 = vld [vmem:[%s3604_s11 + $0x50] sm:$0xff] }
 0x552   : > { %2878 = vmatprep.subr.bf16.mxu1 %v2773_v11 }
 0x553   : > { %2879 = vmatpush1.bf16.msra.mxu1 %v2772_v12 }
 0x554   : > { %2915 = vmatprep.subr.bf16.mxu1 %v3719_v19 }
 0x556   : > { %3118 = vmatmul.mubr.msk.bf16.vlgmr.msra.gmra.mrb[24].mxu1 %vm2825_vm11, %v3260_v42 }
 0x557   : > { %2916 = vmatpush1.bf16.msra.mxu1 %v3703_v16  ;;  %2947 = vmatprep.mubr.bf16.mxu1 %v5213_v41 }
 0x558   : > { %2917 = vmatprep.subr.bf16.mxu1 %v5241_v26  ;;  %v5296_v26 = vld [vmem:[#allocation37_spill] sm:$0xff] }
 0x559   : > { %v2737_v47 = vpop.f32.mrb[16].mxu0 }
 0x55a   : > { %v3147_v4 = vadd.f32 %v2737_v47, %v2458_v14  ;;  %v2739_v10 = vpop.f32.mrb[17].mxu0 }
 0x55b   : > { %v3148_v48 = vadd.f32 %v2739_v10, %v2458_v14  ;;  %v2741_v2 = vpop.f32.mrb[18].mxu0  ;;  %2918 = vmatpush1.bf16.msra.mxu1 %v5243_v31  ;;  %v5297_v31 = vld [vmem:[#allocation38_spill] sm:$0xff] }
 0x55c   : > { %v2750_v9 = vmax.f32 %v3147_v4, 0.0  ;;  %v3149_v0 = vadd.f32 %v2741_v2, %v4951_v44  ;;  %v2743_v62 = vpop.f32.mrb[19].mxu0  ;;  %2919 = vmatprep.subr.bf16.mxu1 %v4726_v5  ;;  %v2969_v4 = vld [vmem:[%s3604_s11 + $0x58] sm:$0xff] }
 0x55d   : > { %v2751_v19 = vmax.f32 %v3148_v48, 0.0  ;;  %v3150_v16 = vadd.f32 %v2743_v62, %v4951_v44  ;;  %v2813_v44 = vpop.permute.xlu1 %2812 }
 0x55e   : > { %v2756_v41 = vmax.f32 %v3149_v0, 0.0  ;;  %v2762_v61 = vmul.f32 %v2750_v9, %v5296_v26 }
 0x55f   : > { %v2757_v3 = vmax.f32 %v3150_v16, 0.0  ;;  %2920 = vmatpush1.bf16.msra.mxu1 %v4724_v6  ;;  %v2763_v25 = vmul.f32 %v2751_v19, %v5297_v31  ;;  %v2958_v6 = vld [vmem:[%s3604_s11] sm:$0xff] }
 0x560   : > { %v2768_v14 = vmul.f32 %v2756_v41, %v5296_v26 }
 0x561   : > { %v2769_v32 = vmul.f32 %v2757_v3, %v5297_v31 }
 0x562   : > { %v2774_v33 = vpack.c.bf16 %v2768_v14, %v2762_v61 }
 0x563   : > { %v2775_v5 = vpack.c.bf16 %v2769_v32, %v2763_v25 }
 0x565   : > { %2921 = vmatprep.subr.bf16.mxu1 %v2775_v5 }
 0x566   : > { %2922 = vmatpush1.bf16.msra.mxu1 %v2774_v33 }
 0x569   : > { %3119 = vmatmul.mubr.msk.bf16.vlgmr.msra.gmra.mrb[28].mxu1 %vm2825_vm11, %v3260_v42  ;;  %v2960_v42 = vld [vmem:[%s3604_s11 + $0x10] sm:$0xff]  ;;  %s3319_s11 = scalar_lea.vmem %s5023_s24, 1536 }
 0x56a   : > { %p3320_p9 = scmp.ne.s32.totalorder %s5023_s24, %s3319_s11  ;;  %p3327_p0 = scmp.lt.s32.totalorder %s3325_s29, %s3319_s11 }
 0x56c   : > { %p3321_p2 = pnand %p3320_p9, %p5298_p10  ;;  %p3328_p6 = por %p3327_p0, %p3326_p5 }
 0x56e   : > { %p3322_p4 = pneg %p3321_p2 }
 0x570   : > { %p3329_p13 = pnand %p3328_p6, %p3322_p4 }
 0x5d0   : > { %v2863_v58 = vpop.f32.mrb[20].mxu1 }
 0x5d1   : > { %v2864_v52 = vadd.f32 %v2863_v58, %v2813_v44  ;;  %v2865_v55 = vpop.f32.mrb[21].mxu1 }
 0x5d2   : > { %v2866_v59 = vadd.f32 %v2865_v55, %v2813_v44  ;;  %v2867_v38 = vpop.f32.mrb[22].mxu1 }
 0x5d3   : > { %v2970_v37 = vadd.f32 %v2958_v6, %v2864_v52  ;;  %v2868_v43 = vadd.f32 %v2867_v38, %v2818_v8  ;;  %v2869_v53 = vpop.f32.mrb[23].mxu1 }
 0x5d4   : > { %v2971_v1 = vadd.f32 %v2959_v54, %v2866_v59  ;;  %v2870_v18 = vadd.f32 %v2869_v53, %v2818_v8 }
 0x5d5   : > { %2982 = vst [vmem:[%s4997_s27] sm:$0xff] %v2970_v37  ;;  %v2976_v36 = vadd.f32 %v2964_v22, %v2868_v43 }
 0x5d6   : > { %2983 = vst [vmem:[%s4997_s27 + $0x8] sm:$0xff] %v2971_v1  ;;  %v2977_v39 = vadd.f32 %v2965_v50, %v2870_v18 }
 0x5d7   : > { %2988 = vst [vmem:[%s4997_s27 + $0x30] sm:$0xff] %v2976_v36 }
 0x5d8   : > { %2989 = vst [vmem:[%s4997_s27 + $0x38] sm:$0xff] %v2977_v39 }
 0x629   : > { %v2906_v60 = vpop.f32.mrb[24].mxu1 }
 0x62a   : > { %v2907_v46 = vadd.f32 %v2906_v60, %v2813_v44  ;;  %v2908_v57 = vpop.f32.mrb[25].mxu1 }
 0x62b   : > { %v2909_v21 = vadd.f32 %v2908_v57, %v2813_v44  ;;  %v2910_v23 = vpop.f32.mrb[26].mxu1 }
 0x62c   : > { %v2972_v30 = vadd.f32 %v2960_v42, %v2907_v46  ;;  %v2911_v45 = vadd.f32 %v2910_v23, %v2818_v8  ;;  %v2912_v20 = vpop.f32.mrb[27].mxu1 }
 0x62d   : > { %v2973_v15 = vadd.f32 %v2961_v17, %v2909_v21  ;;  %v2913_v63 = vadd.f32 %v2912_v20, %v2818_v8 }
 0x62e   : > { %2984 = vst [vmem:[%s4997_s27 + $0x10] sm:$0xff] %v2972_v30  ;;  %v2978_v24 = vadd.f32 %v2966_v27, %v2911_v45 }
 0x62f   : > { %2985 = vst [vmem:[%s4997_s27 + $0x18] sm:$0xff] %v2973_v15  ;;  %v2979_v7 = vadd.f32 %v2967_v35, %v2913_v63 }
 0x630   : > { %2990 = vst [vmem:[%s4997_s27 + $0x40] sm:$0xff] %v2978_v24 }
 0x631   : > { %2991 = vst [vmem:[%s4997_s27 + $0x48] sm:$0xff] %v2979_v7 }
 0x63c   : > { %v2949_v34 = vpop.f32.mrb[28].mxu1 }
 0x63d   : > { %v2950_v51 = vadd.f32 %v2949_v34, %v2813_v44  ;;  %v2951_v40 = vpop.f32.mrb[29].mxu1 }
 0x63e   : > { %v2952_v56 = vadd.f32 %v2951_v40, %v2813_v44  ;;  %v2953_v28 = vpop.f32.mrb[30].mxu1 }
 0x63f   : > { %v2974_v12 = vadd.f32 %v2962_v29, %v2950_v51  ;;  %v2954_v11 = vadd.f32 %v2953_v28, %v2818_v8  ;;  %v2955_v47 = vpop.f32.mrb[31].mxu1 }
 0x640   : > { %v2975_v10 = vadd.f32 %v2963_v49, %v2952_v56  ;;  %v2956_v48 = vadd.f32 %v2955_v47, %v2818_v8 }
 0x641   : > { %2986 = vst [vmem:[%s4997_s27 + $0x20] sm:$0xff] %v2974_v12  ;;  %v2980_v2 = vadd.f32 %v2968_v13, %v2954_v11 }
 0x642   : > { %2987 = vst [vmem:[%s4997_s27 + $0x28] sm:$0xff] %v2975_v10  ;;  %v2981_v9 = vadd.f32 %v2969_v4, %v2956_v48 }
 0x643   : > { %2992 = vst [vmem:[%s4997_s27 + $0x50] sm:$0xff] %v2980_v2 }
 0x644   : > { %2993 = vst [vmem:[%s4997_s27 + $0x58] sm:$0xff] %v2981_v9 }
 0x645   : > { %3332 = shalt.err (!%p3329_p13)
}
 0x646   : > { %s3333_s28 = scalar_lea.hbm %s5021_s17, 1536  ;;  %s3337_s22 = scalar_lea.hbm %s5080_s10, 3072 }
 0x647   : > { %p3334_p7 = scmp.ne.s32.totalorder %s5021_s17, %s3333_s28  ;;  %p3338_p1 = scmp.lt.u32.totalorder %s5021_s17, %s5080_s10 }
 0x648   : > { %p3339_p11 = scmp.lt.u32.totalorder %s3337_s22, %s3333_s28  ;;  %p3341_p9 = scmp.lt.u32.totalorder %s3333_s28, %s5021_s17 }
 0x649   : > { %p3335_p3 = pnand %p3334_p7, %p5298_p10 }
 0x64a   : > { %p3340_p8 = por %p3339_p11, %p3338_p1 }
 0x64b   : > { %p3336_p12 = pneg %p3335_p3 }
 0x64c   : > { %p3342_p2 = por %p3341_p9, %p3340_p8 }
 0x64e   : > { %p3343_p4 = pnand %p3342_p2, %p3336_p12 }
 0x650   : > { %3346 = shalt.err (!%p3343_p4)
}
 0x651   : > { %s3405_s12 = smov 768   ;;  %s3406_s26 = smov 48  }
 0x652   : > { %3181 = dma.vmem_to_hbm [thread:$0]  (%p5298_p10), %s5023_s24, 1536, %s5021_s17, %s2995_s23, %s3405_s12, %s3405_s12, %s3406_s26  }
 0x653 PF: > { %s5299_s11 = sld [smem:[#allocation16_spill]]  ;;  %s3023_s30 = sand.u32 1, %s3377_s13  }
 0x654   : > { %p5301_p0 = scmp.ge.s32.totalorder %s3389_s16, 2  ;;  %s3024_s21 = scalar_lea.sflag [#allocation6], %s3023_s30 }
 0x659   : > { %p5300_p5 = scmp.ne.s32.totalorder %s5299_s11, 0 }
 0x65b   : > { %p3192_p6 = pnand %p5301_p0, %p5300_p5 }
 0x65d   : > { %3372 = dma.done.wait (!%p3192_p6), %s3024_s21, 1536  }
 0x65e   : > { %3374 = vsyncadd (!%p3192_p6), %s3024_s21, 4294965760  ;;  %s5302_s16 = sld [smem:[#allocation14_spill]]  ;;  %s5303_s29 = sld [smem:[#allocation13_spill]] }
 0x65f   : > { %s5304_s15 = sld [smem:[#allocation15_spill]]  ;;  %s5305_s13 = smov %s3381_s14 }
 0x664   : > { %p24_p13 = scmp.ge.s32.totalorder %s5302_s16, 4   ;;  %s5306_s14 = smov %s5303_s29 }
 0x666   :  { %26 = sbr.rel (!%p24_p13) target bundleno = 6 (0x6), region = 109 }
 0x66d   :  { %3029 = vsyncpa [#allocation5], 1 }
 0x66e   :  { %3031 = vsyncpa [#allocation5 + $0x1], 1 }
 0x66f   :  { %3032 = vsyncpa [#allocation8], 1 }
 0x670   :  { %3033 = vsyncpa [#allocation6], 1 }
 0x671   :  { %3035 = vsyncpa [#allocation6 + $0x1], 1 }

</bundles_post_ra>
